<compile_context>
chip_gen: v5e
topology: v5e:2x2
jax: 0.10.0
libtpu: 0.0.40
codegen_flags: <defaults>
</compile_context>

<pallas_src>
import functools

import jax
import jax.numpy as jnp
from jax import lax
from jax.experimental import pallas as pl
from jax.experimental.pallas import tpu as pltpu


def _primary_caps_kernel(x_ref, w_ref, b_ref, out_ref, *, cp):
    """One grid step: one (A, THW) channel-major strip of pixels.

    y   = x^T @ [Wp | Wa] + [bp | ba]        (THW, Cp + Ca), f32 accumulation
    out = [ y[:, :cp] , sigmoid(y[:, cp:]) ]
    """
    # lhs-transposed contraction: channel dim (0) of the x strip against
    # dim 0 of the fused weight -> (THW, Cout).  Avoids any wrapper transpose.
    y = lax.dot_general(
        x_ref[...], w_ref[...],
        dimension_numbers=(((0,), (0,)), ((), ())),
        preferred_element_type=jnp.float32,
    ) + b_ref[...]

    # cp (=512) is a multiple of 128, so the pose store is unmasked and
    # lane-dense; the 32-wide activation tail is a small masked store.
    out_ref[:, :cp] = y[:, :cp].astype(out_ref.dtype)
    out_ref[:, cp:] = jax.nn.sigmoid(y[:, cp:]).astype(out_ref.dtype)


def _pick_tile_hw(hw, target):
    """Pixel tile along H*W.

    Full extent if HW is small (always legal, even unaligned); otherwise the
    largest multiple of 128 <= target that divides HW exactly (no ragged
    edge).  If no divisor exists, fall back to `target` rounded down to 128
    and let Pallas mask the partial edge block.
    """
    if hw <= target:
        return hw
    t_cap = max(128, target - target % 128)
    for t in range(t_cap, 127, -128):
        if hw % t == 0:
            return t
    return t_cap


def primary_caps_forward(x_nchw, wp, bp, wa, ba, *, tile_hw=1024, out_dtype=None):
    """PrimaryCaps forward.

    x_nchw : (N, A, H, W)  float32
    wp     : (A, B*P*P)    pose 1x1-conv weight as a channel matmul
    bp     : (B*P*P,)      pose bias
    wa     : (A, B)        activation 1x1-conv weight
    ba     : (B,)          activation bias
    returns: (N, H, W, B*P*P + B)

    out_dtype: optionally bfloat16 (accumulation stays f32); this kernel is
    purely writeback-bound, so halving output bytes is ~2x wall clock if the
    consumer tolerates it.  Default keeps the input dtype (f32, PyTorch-exact).
    """
    N, A, H, W = x_nchw.shape
    Cp = wp.shape[1]
    Ca = wa.shape[1]
    Cout = Cp + Ca
    HW = H * W
    out_dtype = x_nchw.dtype if out_dtype is None else out_dtype

    # Free reshape: NCHW is already (N, A, H*W)-contiguous.  No transpose, no
    # row padding, no output slice -- the kernel writes the final layout.
    x3 = x_nchw.reshape(N, A, HW)

    # Fuse both convs into one MXU matmul: W = [Wp | Wa], b = [bp | ba].
    w_fused = jnp.concatenate([wp, wa], axis=1)                    # (A, Cout)
    b_fused = jnp.concatenate([bp, ba], axis=0).reshape(1, Cout)   # (1, Cout)

    thw = _pick_tile_hw(HW, tile_hw)
    grid = (N, pl.cdiv(HW, thw))

    m_total = N * HW
    cost = pl.CostEstimate(
        flops=2 * m_total * A * Cout,
        transcendentals=m_total * Ca,
        bytes_accessed=4 * (m_total * A + m_total * Cout + A * Cout + Cout),
    )

    # VMEM budget (thw=1024, f32): out tile 1024x640(lane-pad)x4B ~= 2.5 MB,
    # double-buffered ~5 MB, + ~0.5 MB x/W buffers -> well under the default
    # scoped VMEM on v5e (16 MiB), v6e (32 MiB) and v7x (32 MiB).
    out = pl.pallas_call(
        functools.partial(_primary_caps_kernel, cp=Cp),
        out_shape=jax.ShapeDtypeStruct((N, HW, Cout), out_dtype),
        grid_spec=pltpu.PrefetchScalarGridSpec(
            num_scalar_prefetch=0,
            grid=grid,
            in_specs=[
                # Channel-major pixel strip for one image.
                pl.BlockSpec((pl.Squeezed(), A, thw), lambda n, j: (n, 0, j)),
                pl.BlockSpec((A, Cout), lambda n, j: (0, 0)),      # fused W
                pl.BlockSpec((1, Cout), lambda n, j: (0, 0)),      # fused bias
            ],
            out_specs=pl.BlockSpec((pl.Squeezed(), thw, Cout),
                                   lambda n, j: (n, j, 0)),
        ),
        compiler_params=pltpu.CompilerParams(
            dimension_semantics=("parallel", "parallel")),
        cost_estimate=cost,
    )(x3, w_fused, b_fused)

    return out.reshape(N, H, W, Cout)


if __name__ == "__main__":
    # Module hyperparameters (defaults of PrimaryCaps).
    A, B, K, P, stride = 32, 32, 1, 4, 1
    Cp = B * P * P        # 512
    Ca = B                # 32

    # Small input consistent with the module: batch=2, channels=A=32, spatial=16.
    N, H, W = 2, 16, 16

    key = jax.random.PRNGKey(0)
    kx, kwp, kbp, kwa, kba = jax.random.split(key, 5)

    x = jax.random.normal(kx, (N, A, H, W), dtype=jnp.float32)

    # Conv2d(A, Cout, 1) weights reshaped to (A, Cout) so the 1x1 conv is a
    # channel matmul.
    wp = jax.random.normal(kwp, (A, Cp), dtype=jnp.float32) * (1.0 / A**0.5)
    bp = jax.random.normal(kbp, (Cp,), dtype=jnp.float32) * 0.01
    wa = jax.random.normal(kwa, (A, Ca), dtype=jnp.float32) * (1.0 / A**0.5)
    ba = jax.random.normal(kba, (Ca,), dtype=jnp.float32) * 0.01

    out = jax.jit(primary_caps_forward)(x, wp, bp, wa, ba)
    out = jax.block_until_ready(out)

    # Reference in plain JAX (same semantics as the PyTorch forward).
    x_nhwc = jnp.transpose(x, (0, 2, 3, 1))
    pose_ref = jnp.einsum("nhwa,ac->nhwc", x_nhwc, wp) + bp
    a_ref = jax.nn.sigmoid(jnp.einsum("nhwa,ac->nhwc", x_nhwc, wa) + ba)
    ref = jnp.concatenate([pose_ref, a_ref], axis=-1)

    assert out.shape == (N, H, W, Cp + Ca), out.shape
    assert jnp.allclose(out, ref, atol=1e-5, rtol=1e-5)

    print("KERNEL_OK")
</pallas_src>

<mosaic_0001>
module attributes {stable_mosaic.version = 11 : i64} {
  func.func @_primary_caps_kernel(%arg0: i32, %arg1: i32, %arg2: memref<1x32x256xf32, #tpu.memory_space<vmem>>, %arg3: memref<32x544xf32, #tpu.memory_space<vmem>>, %arg4: memref<1x544xf32, #tpu.memory_space<vmem>>, %arg5: memref<1x256x544xf32, #tpu.memory_space<vmem>>) attributes {dimension_semantics = [#tpu.dimension_semantics<parallel>, #tpu.dimension_semantics<parallel>], iteration_bounds = array<i64: 2, 1>, scalar_prefetch = 0 : i64, scratch_operands = 0 : i64, tpu.core_type = #tpu.core_type<tc>, window_params = [{transform_indices = @transform_0, window_bounds = array<i64: 1, 32, 256>}, {pipeline_mode = #tpu.pipeline_mode<synchronous>, transform_indices = @transform_1, window_bounds = array<i64: 32, 544>}, {pipeline_mode = #tpu.pipeline_mode<synchronous>, transform_indices = @transform_2, window_bounds = array<i64: 1, 544>}, {transform_indices = @transform_3, window_bounds = array<i64: 1, 256, 544>}]} {
    %c0 = arith.constant 0 : index
    %c0_0 = arith.constant 0 : index
    %c0_1 = arith.constant 0 : index
    %0 = vector.load %arg2[%c0, %c0_0, %c0_1] : memref<1x32x256xf32, #tpu.memory_space<vmem>>, vector<1x32x256xf32>
    %1 = vector.shape_cast %0 : vector<1x32x256xf32> to vector<32x256xf32>
    %c0_2 = arith.constant 0 : index
    %c0_3 = arith.constant 0 : index
    %2 = vector.load %arg3[%c0_2, %c0_3] : memref<32x544xf32, #tpu.memory_space<vmem>>, vector<32x544xf32>
    %cst = arith.constant dense<0.000000e+00> : vector<256x544xf32>
    %3 = tpu.matmul %1, %2, %cst {dimension_numbers = #tpu.dot_dimension_numbers<[0], [0], [1], [1], [0, 1, 1, 1], [], []>} : vector<32x256xf32>, vector<32x544xf32>, vector<256x544xf32> -> vector<256x544xf32>
    %c0_4 = arith.constant 0 : index
    %c0_5 = arith.constant 0 : index
    %4 = vector.load %arg4[%c0_4, %c0_5] : memref<1x544xf32, #tpu.memory_space<vmem>>, vector<1x544xf32>
    %5 = vector.broadcast %4 : vector<1x544xf32> to vector<256x544xf32>
    %6 = arith.addf %3, %5 : vector<256x544xf32>
    %7 = vector.extract_strided_slice %6 {offsets = [0, 0], sizes = [256, 512], strides = [1, 1]} : vector<256x544xf32> to vector<256x512xf32>
    %c0_6 = arith.constant 0 : index
    %c0_7 = arith.constant 0 : index
    %c0_8 = arith.constant 0 : index
    %8 = vector.load %arg5[%c0_6, %c0_7, %c0_8] : memref<1x256x544xf32, #tpu.memory_space<vmem>>, vector<1x256x512xf32>
    %9 = vector.shape_cast %8 : vector<1x256x512xf32> to vector<256x512xf32>
    %10 = vector.shape_cast %7 : vector<256x512xf32> to vector<1x256x512xf32>
    tpu.vector_store %arg5[%c0_6, %c0_7, %c0_8], %10 {strides = array<i32>} : memref<1x256x544xf32, #tpu.memory_space<vmem>>, vector<1x256x512xf32>,
    %11 = vector.extract_strided_slice %6 {offsets = [0, 512], sizes = [256, 32], strides = [1, 1]} : vector<256x544xf32> to vector<256x32xf32>
    %12 = arith.negf %11 : vector<256x32xf32>
    %13 = math.exp %12 : vector<256x32xf32>
    %cst_9 = arith.constant 1.000000e+00 : f32
    %14 = vector.broadcast %cst_9 : f32 to vector<256x32xf32>
    %15 = arith.addf %14, %13 : vector<256x32xf32>
    %16 = arith.divf %14, %15 : vector<256x32xf32>
    %c0_10 = arith.constant 0 : index
    %c0_11 = arith.constant 0 : index
    %c512 = arith.constant 512 : index
    %17 = vector.load %arg5[%c0_10, %c0_11, %c512] : memref<1x256x544xf32, #tpu.memory_space<vmem>>, vector<1x256x32xf32>
    %18 = vector.shape_cast %17 : vector<1x256x32xf32> to vector<256x32xf32>
    %19 = vector.shape_cast %16 : vector<256x32xf32> to vector<1x256x32xf32>
    tpu.vector_store %arg5[%c0_10, %c0_11, %c512], %19 {strides = array<i32>} : memref<1x256x544xf32, #tpu.memory_space<vmem>>, vector<1x256x32xf32>,
    return
  }
  func.func @transform_0(%arg0: i32, %arg1: i32) -> (i32, i32, i32) {
    %c0_i32 = arith.constant 0 : i32
    %c0_i32_0 = arith.constant 0 : i32
    return %arg0, %c0_i32, %arg1 : i32, i32, i32
  }
  func.func @transform_1(%arg0: i32, %arg1: i32) -> (i32, i32) {
    %c0_i32 = arith.constant 0 : i32
    %c0_i32_0 = arith.constant 0 : i32
    %c0_i32_1 = arith.constant 0 : i32
    return %c0_i32, %c0_i32_0 : i32, i32
  }
  func.func @transform_2(%arg0: i32, %arg1: i32) -> (i32, i32) {
    %c0_i32 = arith.constant 0 : i32
    %c0_i32_0 = arith.constant 0 : i32
    %c0_i32_1 = arith.constant 0 : i32
    return %c0_i32, %c0_i32_0 : i32, i32
  }
  func.func @transform_3(%arg0: i32, %arg1: i32) -> (i32, i32, i32) {
    %c0_i32 = arith.constant 0 : i32
    %c0_i32_0 = arith.constant 0 : i32
    return %arg0, %arg1, %c0_i32 : i32, i32, i32
  }
}

</mosaic_0001>

<bundles_post_ra>
// kernel: primary_caps_forward.1
= control target key start
LH: loop header
LB: loop body
LE: loop exit
PB: predicated region body
PF: predicated region fallthrough
CT: control target
= control target key end

     0   :  { %8 = vsyncpa [#allocation3], 0  ;;  %s3466_s0 = inlined_call_operand.vmem [shape: f32[2,32,256], index: 0, kind: input, shape index: {}]   ;;  %s3467_s1 = inlined_call_operand.vmem [shape: f32[32,544], index: 1, kind: input, shape index: {}]   ;;  %s3468_s2 = inlined_call_operand.vmem [shape: f32[1,544], index: 2, kind: input, shape index: {}]   ;;  %s3469_s3 = inlined_call_operand.hbm [shape: f32[2,256,544], index: 3, kind: output, shape index: {}]  }
   0x1   :  { %10 = vsyncpa [#allocation3 + $0x1], 0  ;;  %s2337_s12 = smov 0   ;;  %s2339_s13 = smov 0  }
   0x2   :  { %s2341_s14 = smov 0   ;;  %s2343_s15 = smov 0  }
   0x3   :  { %s2345_s16 = smov 0   ;;  %s2347_s17 = smov 0  }
   0x4 LB: > { %s1832_s18 = sadd.s32 4294967295, %s2313_s17   ;;  %s1833_s19 = sadd.s32 4294967294, %s2313_s17   ;;  %s2313_s17 = sphi %s2347_s17, %s16_s17   ;;  %s2309_s16 = sphi %s2345_s16, %s3476_s16   ;;  %s2305_s15 = sphi %s2343_s15, %s3475_s15   ;;  %s2301_s14 = sphi %s2341_s14, %s3474_s14   ;;  %s2297_s13 = sphi %s2339_s13, %s3473_s13   ;;  %s2293_s12 = sphi %s2337_s12, %s3472_s12  }
   0x5   : > { %s28_s20 = sadd.s32 1, %s2309_s16  ;;  %s107_s21 = sadd.s32 1, %s2301_s14 }
   0x6   : > { %p30_p0 = scmp.ge.s32.totalorder %s28_s20, 2  ;;  %p117_p1 = scmp.ne.s32.totalorder %s2301_s14, %s2297_s13 }
   0x7   : > { %p118_p2 = scmp.eq.s32.totalorder %s1832_s18, 1  ;;  %p123_p3 = scmp.ne.s32.totalorder %s2297_s13, %s2293_s12 }
   0x8   : > { %s3478_s20 = smov (%p30_p0, %s28_s20), 0  ;;  %p124_p5 = scmp.eq.s32.totalorder %s1833_s19, 1 }
   0x9   : > { %p2377_p4 = por %p118_p2, %p117_p1  ;;  %s102_s23 = ssub.s32 %s2309_s16, %s3478_s20 }
   0xa   : > { %p1836_p6 = scmp.ge.s32.totalorder %s2313_s17, 1  ;;  %p105_p7 = scmp.eq.s32.totalorder %s102_s23, 0 }
   0xb   : > { %p2384_p8 = por %p124_p5, %p123_p3  ;;  %p161_p9 = scmp.lt.s32.totalorder %s2313_s17, 3 }
   0xc   : > { %s2390_s25 = scalar_select %p105_p7, %s2301_s14, %s107_s21  }
   0xd   : > { %p162_p10 = pnand %p1836_p6, %p161_p9 }
   0xe   : > { %p190_p11 = scmp.lt.s32.totalorder (!%p162_p10), %s2305_s15, 1  ;;  %s186_s10 = sand.u32 (!%p162_p10), 1, %s2297_s13  }
   0xf   : > { %165 = sbr.rel (%p162_p10) target bundleno = 706 (0x2c2), region = 32  ;;  %s2255_s8 = scalar_lea.hbm (!%p162_p10), %s3469_s3, 2560 }
  0x10   : > { %s2047_s19 = smul.u32 (!%p162_p10), 1280, %s186_s10 }
  0x11   : > { %s2048_s23 = smul.u32 (!%p162_p10), 1280, %s2305_s15 }
  0x12   : > { %s2629_s21 = scalar_lea.vmem (!%p162_p10), [#allocation2], %s2047_s19 }
  0x13   : > { %s1749_s28 = scalar_lea.hbm (!%p162_p10), %s3469_s3, %s2048_s23  ;;  %s1750_s29 = sshll.u32 (!%p162_p10), %s2629_s21, 4  ;;  %s1751_s29 = int_to_ptr.vmem [resolvable:$true] %s1750_s29 }
  0x14   : > { %v223_v0 = vld [vmem:[%s3467_s1 + $0x78] sm:$0xff]  ;;  %v218_v1 = vld [vmem:[%s3467_s1 + $0x50] sm:$0xff]  ;;  %s191_s30 = scalar_select %p190_p11, %s2305_s15, 1  ;;  %v213_v2 = vld [vmem:[%s3467_s1 + $0x28] sm:$0xff]  ;;  %vm304_vm0 = vcmask 261120  }
  0x15   : > { %413 = vmatpush.msra.mxu0 %v223_v0  ;;  %2036 = vmatpush.msra.mxu2 %v223_v0  ;;  %v208_v3 = vld [vmem:[%s3467_s1] sm:$0xff]  ;;  %v227_v16 = vld [vmem:[%s3467_s1 + $0x98] sm:$0xff]  ;;  %v225_v21 = vld [vmem:[%s3467_s1 + $0x88] sm:$0xff]  ;;  %s1735_s15 = scalar_lea.sflag [#allocation3], %s186_s10 }
  0x16   : > { %2035 = vmatpush.msra.mxu1 %v223_v0  ;;  %2037 = vmatpush.msra.mxu3 %v223_v0  ;;  %s2034_s6 = sshll.u32 %s191_s30, 6  ;;  %v222_v22 = vld [vmem:[%s3467_s1 + $0x70] sm:$0xff]  ;;  %v220_v23 = vld [vmem:[%s3467_s1 + $0x60] sm:$0xff]  ;;  %v217_v24 = vld [vmem:[%s3467_s1 + $0x48] sm:$0xff]  ;;  %s1752_s30 = sshll.u32 %s1749_s28, 4  ;;  %s1753_s30 = int_to_ptr.hbm [resolvable:$true] %s1752_s30 }
  0x17   : > { %414 = vmatpush.msra.mxu0 %v218_v1  ;;  %2039 = vmatpush.msra.mxu2 %v218_v1  ;;  %s197_s9 = scalar_lea.vmem %s3466_s0, %s2034_s6  ;;  %v215_v25 = vld [vmem:[%s3467_s1 + $0x38] sm:$0xff]  ;;  %v212_v26 = vld [vmem:[%s3467_s1 + $0x20] sm:$0xff]  ;;  %v210_v27 = vld [vmem:[%s3467_s1 + $0x10] sm:$0xff]  ;;  %s2249_s4 = sshra.s32 %s1753_s30, 4  ;;  %s2250_s4 = int_to_ptr.hbm [resolvable:$true] %s2249_s4 }
  0x18   : > { %2038 = vmatpush.msra.mxu1 %v218_v1  ;;  %2040 = vmatpush.msra.mxu3 %v218_v1  ;;  %v201_v4 = vld [vmem:[%s197_s9 + $0x8] sm:$0xff]  ;;  %v200_v5 = vld [vmem:[%s197_s9] sm:$0xff]  ;;  %v203_v6 = vld [vmem:[%s197_s9 + $0x18] sm:$0xff]  ;;  %s2251_s5 = scalar_lea.hbm %s2250_s4, 1280  ;;  %p2256_p1 = scmp.lt.s32.totalorder %s2250_s4, %s3469_s3 }
  0x19   : > { %415 = vmatpush.msra.mxu0 %v213_v2  ;;  %2042 = vmatpush.msra.mxu2 %v213_v2  ;;  %v202_v7 = vld [vmem:[%s197_s9 + $0x10] sm:$0xff]  ;;  %v205_v8 = vld [vmem:[%s197_s9 + $0x28] sm:$0xff]  ;;  %v204_v9 = vld [vmem:[%s197_s9 + $0x20] sm:$0xff]  ;;  %p2252_p12 = scmp.ne.s32.totalorder %s2250_s4, %s2251_s5  ;;  %p2257_p2 = scmp.lt.s32.totalorder %s2255_s8, %s2251_s5 }
  0x1a   : > { %2041 = vmatpush.msra.mxu1 %v213_v2  ;;  %2043 = vmatpush.msra.mxu3 %v213_v2  ;;  %v207_v10 = vld [vmem:[%s197_s9 + $0x38] sm:$0xff]  ;;  %v206_v11 = vld [vmem:[%s197_s9 + $0x30] sm:$0xff]  ;;  %v224_v31 = vld [vmem:[%s3467_s1 + $0x80] sm:$0xff] }
  0x1b   : > { %272 = vxpose.xlu0.b32.start [1/4] (short) %v201_v4, 128  ;;  %240 = vxpose.xlu1.b32.start [1/4] (short) %v200_v5, 128  ;;  %v226_v30 = vld [vmem:[%s3467_s1 + $0x90] sm:$0xff]  ;;  %v221_v36 = vld [vmem:[%s3467_s1 + $0x68] sm:$0xff]  ;;  %v219_v37 = vld [vmem:[%s3467_s1 + $0x58] sm:$0xff]  ;;  %p2253_p13 = pnand %p2252_p12, %p2377_p4  ;;  %p2258_p3 = por %p2257_p2, %p2256_p1 }
  0x1c   : > { %416 = vmatpush.msra.mxu0 %v208_v3  ;;  %2045 = vmatpush.msra.mxu2 %v208_v3  ;;  %v216_v42 = vld [vmem:[%s3467_s1 + $0x40] sm:$0xff]  ;;  %v214_v43 = vld [vmem:[%s3467_s1 + $0x30] sm:$0xff]  ;;  %v211_v48 = vld [vmem:[%s3467_s1 + $0x18] sm:$0xff] }
  0x1d   : > { %2044 = vmatpush.msra.mxu1 %v208_v3  ;;  %2046 = vmatpush.msra.mxu3 %v208_v3  ;;  %v209_v49 = vld [vmem:[%s3467_s1 + $0x8] sm:$0xff]  ;;  %v2613_v60 = vld [vmem:[%s3468_s2] sm:$0x1f]  ;;  %p2254_p0 = pneg %p2253_p13 }
  0x1e   : > { %865 = vmatpush.msrb.mxu0 %v227_v16  ;;  %639 = vmatpush.msrb.mxu2 %v225_v21  ;;  %v2626_v61 = vperm.slane %v2613_v60, 0 }
  0x1f   : > { %752 = vmatpush.msrb.mxu3 %v226_v30  ;;  %526 = vmatpush.msrb.mxu1 %v224_v31  ;;  %p2259_p5 = pnand %p2258_p3, %p2254_p0 }
  0x20   : > { %866 = vmatpush.msrb.mxu0 %v222_v22  ;;  %640 = vmatpush.msrb.mxu2 %v220_v23 }
  0x21   : > { %753 = vmatpush.msrb.mxu3 %v221_v36  ;;  %527 = vmatpush.msrb.mxu1 %v219_v37  ;;  %v2725_v36 = vperm.slane %v2613_v60, 4 }
  0x22   : > { %867 = vmatpush.msrb.mxu0 %v217_v24  ;;  %641 = vmatpush.msrb.mxu2 %v215_v25 }
  0x23   : > { %273 = vxpose.xlu0.b32.cont [2/4] (short) %v203_v6, 128  ;;  %241 = vxpose.xlu1.b32.cont [2/4] (short) %v202_v7, 128 }
  0x24   : > { %868 = vmatpush.msrb.mxu0 %v212_v26  ;;  %642 = vmatpush.msrb.mxu2 %v210_v27 }
  0x25   : > { %754 = vmatpush.msrb.mxu3 %v216_v42  ;;  %528 = vmatpush.msrb.mxu1 %v214_v43 }
  0x27   : > { %755 = vmatpush.msrb.mxu3 %v211_v48  ;;  %529 = vmatpush.msrb.mxu1 %v209_v49 }
  0x2b   : > { %274 = vxpose.xlu0.b32.cont [3/4] (short) %v205_v8, 128  ;;  %242 = vxpose.xlu1.b32.cont [3/4] (short) %v204_v9, 128 }
  0x33   : > { %275 = vxpose.xlu0.b32.end [4/4] (short) %v207_v10, 128  ;;  %243 = vxpose.xlu1.b32.end [4/4] (short) %v206_v11, 128 }
  0xbf   : > { %v2409_v12 = vpop.trf.xlu0  ;;  %v2411_v13 = vpop.trf.xlu1 }
  0xc0   : > { %1839 = vmatmul.msk.f32.vlgmr.msra.gmra.mxu0 %vm304_vm0, %v2411_v13  ;;  %1855 = vmatmul.msk.f32.vlgmr.msra.gmra.mxu2 %vm304_vm0, %v2409_v12 }
  0xc7   : > { %v2417_v14 = vpop.trf.xlu0  ;;  %v2419_v15 = vpop.trf.xlu1 }
  0xc8   : > { %1840 = vmatmul.msk.f32.gmra.mxu0 %vm304_vm0, %v2419_v15  ;;  %1856 = vmatmul.msk.f32.gmra.mxu2 %vm304_vm0, %v2417_v14 }
  0xcf   : > { %v2428_v17 = vpop.trf.xlu0  ;;  %v2430_v18 = vpop.trf.xlu1 }
  0xd0   : > { %1841 = vmatmul.msk.f32.gmra.mxu0 %vm304_vm0, %v2430_v18  ;;  %1857 = vmatmul.msk.f32.gmra.mxu2 %vm304_vm0, %v2428_v17 }
  0xd7   : > { %v2436_v19 = vpop.trf.xlu0  ;;  %v2438_v20 = vpop.trf.xlu1 }
  0xd8   : > { %1842 = vmatmul.msk.f32.gmra.mxu0 %vm304_vm0, %v2438_v20  ;;  %1858 = vmatmul.msk.f32.gmra.mxu2 %vm304_vm0, %v2436_v19 }
  0xdf   : > { %v2465_v28 = vpop.trf.xlu0  ;;  %v2467_v29 = vpop.trf.xlu1 }
  0xe0   : > { %1843 = vmatmul.msk.f32.gmra.mxu0 %vm304_vm0, %v2467_v29  ;;  %1859 = vmatmul.msk.f32.gmra.mxu2 %vm304_vm0, %v2465_v28 }
  0xe7   : > { %v2479_v32 = vpop.trf.xlu0  ;;  %v2481_v33 = vpop.trf.xlu1 }
  0xe8   : > { %1844 = vmatmul.msk.f32.gmra.mxu0 %vm304_vm0, %v2481_v33  ;;  %1860 = vmatmul.msk.f32.gmra.mxu2 %vm304_vm0, %v2479_v32 }
  0xef   : > { %v2487_v34 = vpop.trf.xlu0  ;;  %v2489_v35 = vpop.trf.xlu1 }
  0xf0   : > { %1845 = vmatmul.msk.f32.gmra.mxu0 %vm304_vm0, %v2489_v35  ;;  %1861 = vmatmul.msk.f32.gmra.mxu2 %vm304_vm0, %v2487_v34 }
  0xf7   : > { %v2501_v38 = vpop.trf.xlu0  ;;  %v2503_v39 = vpop.trf.xlu1 }
  0xf8   : > { %1846 = vmatmul.msk.f32.gmra.mxu0 %vm304_vm0, %v2503_v39  ;;  %1862 = vmatmul.msk.f32.gmra.mxu2 %vm304_vm0, %v2501_v38 }
  0xff   : > { %v2509_v40 = vpop.trf.xlu0  ;;  %v2511_v41 = vpop.trf.xlu1 }
 0x100   : > { %1847 = vmatmul.msk.f32.vlgmr.msra.gmra.mxu1 %vm304_vm0, %v2511_v41  ;;  %1863 = vmatmul.msk.f32.vlgmr.msra.gmra.mxu3 %vm304_vm0, %v2509_v40 }
 0x101   : > { %1903 = vmatmul.msk.f32.vlgmr.msrb.gmra.mxu2 %vm304_vm0, %v2411_v13  ;;  %1967 = vmatmul.msk.f32.vlgmr.msrb.gmra.mxu0 %vm304_vm0, %v2411_v13 }
 0x107   : > { %v2527_v44 = vpop.trf.xlu0  ;;  %v2529_v45 = vpop.trf.xlu1 }
 0x108   : > { %1848 = vmatmul.msk.f32.gmra.mxu1 %vm304_vm0, %v2529_v45  ;;  %1864 = vmatmul.msk.f32.gmra.mxu3 %vm304_vm0, %v2527_v44 }
 0x109   : > { %1904 = vmatmul.msk.f32.gmra.mxu2 %vm304_vm0, %v2419_v15  ;;  %1968 = vmatmul.msk.f32.gmra.mxu0 %vm304_vm0, %v2419_v15 }
 0x10f   : > { %v2539_v46 = vpop.trf.xlu0  ;;  %v2541_v47 = vpop.trf.xlu1 }
 0x110   : > { %1849 = vmatmul.msk.f32.gmra.mxu1 %vm304_vm0, %v2541_v47  ;;  %1865 = vmatmul.msk.f32.gmra.mxu3 %vm304_vm0, %v2539_v46 }
 0x111   : > { %1905 = vmatmul.msk.f32.gmra.mxu2 %vm304_vm0, %v2430_v18  ;;  %1969 = vmatmul.msk.f32.gmra.mxu0 %vm304_vm0, %v2430_v18 }
 0x117   : > { %v2557_v50 = vpop.trf.xlu0  ;;  %v2559_v51 = vpop.trf.xlu1 }
 0x118   : > { %1850 = vmatmul.msk.f32.gmra.mxu1 %vm304_vm0, %v2559_v51  ;;  %1866 = vmatmul.msk.f32.gmra.mxu3 %vm304_vm0, %v2557_v50 }
 0x119   : > { %1906 = vmatmul.msk.f32.gmra.mxu2 %vm304_vm0, %v2438_v20  ;;  %1970 = vmatmul.msk.f32.gmra.mxu0 %vm304_vm0, %v2438_v20 }
 0x11f   : > { %v2569_v52 = vpop.trf.xlu0  ;;  %v2571_v53 = vpop.trf.xlu1 }
 0x120   : > { %1851 = vmatmul.msk.f32.gmra.mxu1 %vm304_vm0, %v2571_v53  ;;  %1867 = vmatmul.msk.f32.gmra.mxu3 %vm304_vm0, %v2569_v52 }
 0x121   : > { %1907 = vmatmul.msk.f32.gmra.mxu2 %vm304_vm0, %v2467_v29  ;;  %1971 = vmatmul.msk.f32.gmra.mxu0 %vm304_vm0, %v2467_v29 }
 0x127   : > { %v2581_v54 = vpop.trf.xlu0  ;;  %v2583_v55 = vpop.trf.xlu1 }
 0x128   : > { %1852 = vmatmul.msk.f32.gmra.mxu1 %vm304_vm0, %v2583_v55  ;;  %1868 = vmatmul.msk.f32.gmra.mxu3 %vm304_vm0, %v2581_v54 }
 0x129   : > { %1908 = vmatmul.msk.f32.gmra.mxu2 %vm304_vm0, %v2481_v33  ;;  %1972 = vmatmul.msk.f32.gmra.mxu0 %vm304_vm0, %v2481_v33 }
 0x12f   : > { %v2593_v56 = vpop.trf.xlu0  ;;  %v2595_v57 = vpop.trf.xlu1 }
 0x130   : > { %1853 = vmatmul.msk.f32.gmra.mxu1 %vm304_vm0, %v2595_v57  ;;  %1869 = vmatmul.msk.f32.gmra.mxu3 %vm304_vm0, %v2593_v56 }
 0x131   : > { %1909 = vmatmul.msk.f32.gmra.mxu2 %vm304_vm0, %v2489_v35  ;;  %1973 = vmatmul.msk.f32.gmra.mxu0 %vm304_vm0, %v2489_v35 }
 0x137   : > { %v2606_v58 = vpop.trf.xlu0  ;;  %v2608_v59 = vpop.trf.xlu1 }
 0x138   : > { %1854 = vmatmul.msk.f32.gmra.mxu1 %vm304_vm0, %v2608_v59  ;;  %1870 = vmatmul.msk.f32.gmra.mxu3 %vm304_vm0, %v2606_v58 }
 0x139   : > { %1910 = vmatmul.msk.f32.gmra.mxu2 %vm304_vm0, %v2503_v39  ;;  %1974 = vmatmul.msk.f32.gmra.mxu0 %vm304_vm0, %v2503_v39 }
 0x13d   : > { %v418_v62 = vpop.f32.mrf.mxu0 }
 0x13e   : > { %v419_v63 = vadd.f32 %v418_v62, %v2626_v61  ;;  %v2741_v62 = vperm.slane %v2613_v60, 2 }
 0x140   : > { %966 = vst [vmem:[%s2629_s21] sm:$0xff] %v419_v63  ;;  %1871 = vmatmul.msk.f32.vlgmr.msrb.gmra.mxu1 %vm304_vm0, %v2411_v13  ;;  %1935 = vmatmul.msk.f32.vlgmr.msrb.gmra.mxu3 %vm304_vm0, %v2411_v13 }
 0x141   : > { %1911 = vmatmul.msk.f32.gmra.mxu2 %vm304_vm0, %v2511_v41  ;;  %1975 = vmatmul.msk.f32.gmra.mxu0 %vm304_vm0, %v2511_v41 }
 0x143   : > { %v466_v0 = vpop.f32.mrf.mxu2 }
 0x144   : > { %v467_v1 = vadd.f32 %v466_v0, %v2626_v61 }
 0x145   : > { %v421_v2 = vpop.f32.mrf.mxu0 }
 0x146   : > { %1030 = vst [vmem:[%s2629_s21 + $0x280] sm:$0xff] %v467_v1  ;;  %v422_v3 = vadd.f32 %v421_v2, %v2626_v61 }
 0x148   : > { %970 = vst [vmem:[%s2629_s21 + $0x28] sm:$0xff] %v422_v3  ;;  %1872 = vmatmul.msk.f32.gmra.mxu1 %vm304_vm0, %v2419_v15  ;;  %1936 = vmatmul.msk.f32.gmra.mxu3 %vm304_vm0, %v2419_v15 }
 0x149   : > { %1912 = vmatmul.msk.f32.gmra.mxu2 %vm304_vm0, %v2529_v45  ;;  %1976 = vmatmul.msk.f32.gmra.mxu0 %vm304_vm0, %v2529_v45 }
 0x14b   : > { %v469_v4 = vpop.f32.mrf.mxu2 }
 0x14c   : > { %v470_v5 = vadd.f32 %v469_v4, %v2626_v61 }
 0x14d   : > { %v424_v6 = vpop.f32.mrf.mxu0 }
 0x14e   : > { %1034 = vst [vmem:[%s2629_s21 + $0x2a8] sm:$0xff] %v470_v5  ;;  %v425_v7 = vadd.f32 %v424_v6, %v2626_v61 }
 0x150   : > { %974 = vst [vmem:[%s2629_s21 + $0x50] sm:$0xff] %v425_v7  ;;  %1873 = vmatmul.msk.f32.gmra.mxu1 %vm304_vm0, %v2430_v18  ;;  %1937 = vmatmul.msk.f32.gmra.mxu3 %vm304_vm0, %v2430_v18 }
 0x151   : > { %1913 = vmatmul.msk.f32.gmra.mxu2 %vm304_vm0, %v2541_v47  ;;  %1977 = vmatmul.msk.f32.gmra.mxu0 %vm304_vm0, %v2541_v47 }
 0x153   : > { %v472_v8 = vpop.f32.mrf.mxu2 }
 0x154   : > { %v473_v9 = vadd.f32 %v472_v8, %v2626_v61 }
 0x155   : > { %v427_v10 = vpop.f32.mrf.mxu0 }
 0x156   : > { %1038 = vst [vmem:[%s2629_s21 + $0x2d0] sm:$0xff] %v473_v9  ;;  %v428_v11 = vadd.f32 %v427_v10, %v2626_v61 }
 0x158   : > { %978 = vst [vmem:[%s2629_s21 + $0x78] sm:$0xff] %v428_v11  ;;  %1874 = vmatmul.msk.f32.gmra.mxu1 %vm304_vm0, %v2438_v20  ;;  %1938 = vmatmul.msk.f32.gmra.mxu3 %vm304_vm0, %v2438_v20 }
 0x159   : > { %1914 = vmatmul.msk.f32.gmra.mxu2 %vm304_vm0, %v2559_v51  ;;  %1978 = vmatmul.msk.f32.gmra.mxu0 %vm304_vm0, %v2559_v51 }
 0x15b   : > { %v475_v13 = vpop.f32.mrf.mxu2 }
 0x15c   : > { %v476_v15 = vadd.f32 %v475_v13, %v2626_v61 }
 0x15d   : > { %v430_v16 = vpop.f32.mrf.mxu0 }
 0x15e   : > { %1042 = vst [vmem:[%s2629_s21 + $0x2f8] sm:$0xff] %v476_v15  ;;  %v431_v18 = vadd.f32 %v430_v16, %v2626_v61 }
 0x160   : > { %982 = vst [vmem:[%s2629_s21 + $0xa0] sm:$0xff] %v431_v18  ;;  %1875 = vmatmul.msk.f32.gmra.mxu1 %vm304_vm0, %v2467_v29  ;;  %1939 = vmatmul.msk.f32.gmra.mxu3 %vm304_vm0, %v2467_v29 }
 0x161   : > { %1915 = vmatmul.msk.f32.gmra.mxu2 %vm304_vm0, %v2571_v53  ;;  %1979 = vmatmul.msk.f32.gmra.mxu0 %vm304_vm0, %v2571_v53 }
 0x163   : > { %v478_v20 = vpop.f32.mrf.mxu2 }
 0x164   : > { %v479_v21 = vadd.f32 %v478_v20, %v2626_v61 }
 0x165   : > { %v433_v22 = vpop.f32.mrf.mxu0 }
 0x166   : > { %1046 = vst [vmem:[%s2629_s21 + $0x320] sm:$0xff] %v479_v21  ;;  %v434_v23 = vadd.f32 %v433_v22, %v2626_v61 }
 0x168   : > { %986 = vst [vmem:[%s2629_s21 + $0xc8] sm:$0xff] %v434_v23  ;;  %1876 = vmatmul.msk.f32.gmra.mxu1 %vm304_vm0, %v2481_v33  ;;  %1940 = vmatmul.msk.f32.gmra.mxu3 %vm304_vm0, %v2481_v33 }
 0x169   : > { %1916 = vmatmul.msk.f32.gmra.mxu2 %vm304_vm0, %v2583_v55  ;;  %1980 = vmatmul.msk.f32.gmra.mxu0 %vm304_vm0, %v2583_v55 }
 0x16b   : > { %v481_v24 = vpop.f32.mrf.mxu2 }
 0x16c   : > { %v482_v25 = vadd.f32 %v481_v24, %v2626_v61 }
 0x16d   : > { %v436_v26 = vpop.f32.mrf.mxu0 }
 0x16e   : > { %1050 = vst [vmem:[%s2629_s21 + $0x348] sm:$0xff] %v482_v25  ;;  %v437_v27 = vadd.f32 %v436_v26, %v2626_v61 }
 0x170   : > { %990 = vst [vmem:[%s2629_s21 + $0xf0] sm:$0xff] %v437_v27  ;;  %1877 = vmatmul.msk.f32.gmra.mxu1 %vm304_vm0, %v2489_v35  ;;  %1941 = vmatmul.msk.f32.gmra.mxu3 %vm304_vm0, %v2489_v35 }
 0x171   : > { %1917 = vmatmul.msk.f32.gmra.mxu2 %vm304_vm0, %v2595_v57  ;;  %1981 = vmatmul.msk.f32.gmra.mxu0 %vm304_vm0, %v2595_v57 }
 0x173   : > { %v484_v29 = vpop.f32.mrf.mxu2 }
 0x174   : > { %v485_v30 = vadd.f32 %v484_v29, %v2626_v61 }
 0x175   : > { %v439_v31 = vpop.f32.mrf.mxu0 }
 0x176   : > { %1054 = vst [vmem:[%s2629_s21 + $0x370] sm:$0xff] %v485_v30  ;;  %v440_v33 = vadd.f32 %v439_v31, %v2626_v61 }
 0x178   : > { %994 = vst [vmem:[%s2629_s21 + $0x118] sm:$0xff] %v440_v33  ;;  %1878 = vmatmul.msk.f32.gmra.mxu1 %vm304_vm0, %v2503_v39  ;;  %1942 = vmatmul.msk.f32.gmra.mxu3 %vm304_vm0, %v2503_v39 }
 0x179   : > { %1918 = vmatmul.msk.f32.gmra.mxu2 %vm304_vm0, %v2608_v59  ;;  %1982 = vmatmul.msk.f32.gmra.mxu0 %vm304_vm0, %v2608_v59 }
 0x17b   : > { %v487_v35 = vpop.f32.mrf.mxu2 }
 0x17c   : > { %v488_v37 = vadd.f32 %v487_v35, %v2626_v61 }
 0x17d   : > { %v442_v42 = vpop.f32.mrf.mxu1 }
 0x17e   : > { %1058 = vst [vmem:[%s2629_s21 + $0x398] sm:$0xff] %v488_v37  ;;  %v443_v43 = vadd.f32 %v442_v42, %v2626_v61  ;;  %v870_v48 = vpop.f32.mrf.mxu0 }
 0x17f   : > { %v871_v39 = vadd.f32 %v870_v48, %v2725_v36 }
 0x180   : > { %998 = vst [vmem:[%s2629_s21 + $0x140] sm:$0xff] %v443_v43  ;;  %1879 = vmatmul.msk.f32.gmra.mxu1 %vm304_vm0, %v2511_v41  ;;  %1943 = vmatmul.msk.f32.gmra.mxu3 %vm304_vm0, %v2511_v41 }
 0x181   : > { %v1999_v49 = vmul.f32 -1.442695, %v871_v39  ;;  %1919 = vmatmul.msk.f32.gmra.mxu2 %vm304_vm0, %v2409_v12  ;;  %1983 = vmatmul.msk.f32.gmra.mxu0 %vm304_vm0, %v2409_v12 }
 0x183   : > { %2107 = vpow2.f32 %v1999_v49  ;;  %v490_v63 = vpop.f32.mrf.mxu3 }
 0x184   : > { %v491_v0 = vadd.f32 %v490_v63, %v2626_v61  ;;  %v644_v1 = vpop.f32.mrf.mxu2 }
 0x185   : > { %v645_v2 = vadd.f32 %v644_v1, %v2741_v62  ;;  %v445_v3 = vpop.f32.mrf.mxu1 }
 0x186   : > { %1062 = vst [vmem:[%s2629_s21 + $0x3c0] sm:$0xff] %v491_v0  ;;  %v446_v41 = vadd.f32 %v445_v3, %v2626_v61  ;;  %v873_v4 = vpop.f32.mrf.mxu0 }
 0x187   : > { %968 = vst [vmem:[%s2629_s21 + $0x10] sm:$0xff] %v645_v2  ;;  %v874_v5 = vadd.f32 %v873_v4, %v2725_v36 }
 0x188   : > { %1002 = vst [vmem:[%s2629_s21 + $0x168] sm:$0xff] %v446_v41  ;;  %1880 = vmatmul.msk.f32.gmra.mxu1 %vm304_vm0, %v2529_v45  ;;  %1944 = vmatmul.msk.f32.gmra.mxu3 %vm304_vm0, %v2529_v45 }
 0x189   : > { %v2108_v6 = vpop.eup %2107  ;;  %v2000_v7 = vmul.f32 -1.442695, %v874_v5  ;;  %1920 = vmatmul.msk.f32.gmra.mxu2 %vm304_vm0, %v2417_v14  ;;  %1984 = vmatmul.msk.f32.gmra.mxu0 %vm304_vm0, %v2417_v14 }
 0x18a   : > { %v1190_v8 = vadd.f32 1.0, %v2108_v6 }
 0x18b   : > { %2109 = vpow2.f32 %v2000_v7  ;;  %v493_v9 = vpop.f32.mrf.mxu3 }
 0x18c   : > { %2111 = vrcp.f32 %v1190_v8  ;;  %v647_v10 = vpop.f32.mrf.mxu2  ;;  %v494_v11 = vadd.f32 %v493_v9, %v2626_v61  ;;  %v1233_v31 = vand.u32 2147483648, %v1190_v8  ;;  %v1231_v42 = vand.u32 2147483647, %v1190_v8 }
 0x18d   : > { %v648_v13 = vadd.f32 %v647_v10, %v2741_v62  ;;  %v448_v45 = vpop.f32.mrf.mxu1  ;;  %vm1227_vm2 = vweird.f32 %v1190_v8 }
 0x18e   : > { %v449_v15 = vadd.f32 %v448_v45, %v2626_v61  ;;  %v876_v16 = vpop.f32.mrf.mxu0  ;;  %1066 = vst [vmem:[%s2629_s21 + $0x3e8] sm:$0xff] %v494_v11  ;;  %v1234_v0 = vor.u32 1.1754944e-38, %v1233_v31  ;;  %vm1232_vm4 = vcmp.eq.f32.partialorder %v1231_v42, 8.507059e+37 }
 0x18f   : > { %v877_v18 = vadd.f32 %v876_v16, %v2725_v36  ;;  %972 = vst [vmem:[%s2629_s21 + $0x38] sm:$0xff] %v648_v13 }
 0x190   : > { %1881 = vmatmul.msk.f32.gmra.mxu1 %vm304_vm0, %v2541_v47  ;;  %1945 = vmatmul.msk.f32.gmra.mxu3 %vm304_vm0, %v2541_v47  ;;  %1006 = vst [vmem:[%s2629_s21 + $0x190] sm:$0xff] %v449_v15 }
 0x191   : > { %v2110_v20 = vpop.eup %2109  ;;  %v2001_v21 = vmul.f32 -1.442695, %v877_v18  ;;  %1921 = vmatmul.msk.f32.gmra.mxu2 %vm304_vm0, %v2428_v17  ;;  %1985 = vmatmul.msk.f32.gmra.mxu0 %vm304_vm0, %v2428_v17 }
 0x192   : > { %v2112_v22 = vpop.eup %2111  ;;  %v2773_v23 = vadd.f32 1.0, %v2110_v20 }
 0x193   : > { %v1223_v24 = vmul.f32 %v2112_v22, %v1190_v8  ;;  %2113 = vpow2.f32 %v2001_v21  ;;  %v496_v25 = vpop.f32.mrf.mxu3  ;;  %vm1228_vm1 = vweird.f32 %v2112_v22 }
 0x194   : > { %2115 = vrcp.f32 %v2773_v23  ;;  %v650_v47 = vpop.f32.mrf.mxu2  ;;  %v497_v27 = vadd.f32 %v496_v25, %v2626_v61  ;;  %vm1229_vm3 = vmor %vm1227_vm2, %vm1228_vm1  ;;  %v1248_v9 = vand.u32 2147483648, %v2773_v23  ;;  %v1246_v45 = vand.u32 2147483647, %v2773_v23 }
 0x195   : > { %v1224_v26 = vsub.f32 1.0, %v1223_v24  ;;  %v651_v29 = vadd.f32 %v650_v47, %v2741_v62  ;;  %v451_v30 = vpop.f32.mrf.mxu1  ;;  %vm1242_vm6 = vweird.f32 %v2773_v23 }
 0x196   : > { %v452_v33 = vadd.f32 %v451_v30, %v2626_v61  ;;  %v879_v35 = vpop.f32.mrf.mxu0  ;;  %1070 = vst [vmem:[%s2629_s21 + $0x410] sm:$0xff] %v497_v27  ;;  %vm1247_vm8 = vcmp.eq.f32.partialorder %v1246_v45, 8.507059e+37 }
 0x197   : > { %v1225_v37 = vmul.f32 %v2112_v22, %v1224_v26  ;;  %v880_v43 = vadd.f32 %v879_v35, %v2725_v36  ;;  %976 = vst [vmem:[%s2629_s21 + $0x60] sm:$0xff] %v651_v29 }
 0x198   : > { %1882 = vmatmul.msk.f32.gmra.mxu1 %vm304_vm0, %v2559_v51  ;;  %1946 = vmatmul.msk.f32.gmra.mxu3 %vm304_vm0, %v2559_v51  ;;  %1010 = vst [vmem:[%s2629_s21 + $0x1b8] sm:$0xff] %v452_v33 }
 0x199   : > { %v2114_v48 = vpop.eup %2113  ;;  %v1226_v39 = vadd.f32 %v2112_v22, %v1225_v37  ;;  %v2002_v49 = vmul.f32 -1.442695, %v880_v43  ;;  %1922 = vmatmul.msk.f32.gmra.mxu2 %vm304_vm0, %v2436_v19  ;;  %1986 = vmatmul.msk.f32.gmra.mxu0 %vm304_vm0, %v2436_v19 }
 0x19a   : > { %v2116_v63 = vpop.eup %2115  ;;  %v2792_v1 = vadd.f32 1.0, %v2114_v48 }
 0x19b   : > { %v1230_v2 = vsel %vm1229_vm3, %v2112_v22, %v1226_v39  ;;  %v1238_v51 = vmul.f32 %v2116_v63, %v2773_v23  ;;  %2117 = vpow2.f32 %v2002_v49  ;;  %v499_v3 = vpop.f32.mrf.mxu3  ;;  %vm1243_vm5 = vweird.f32 %v2116_v63 }
 0x19c   : > { %v1235_v41 = vsel %vm1232_vm4, %v1234_v0, %v1230_v2  ;;  %2119 = vrcp.f32 %v2792_v1  ;;  %v653_v4 = vpop.f32.mrf.mxu2  ;;  %v500_v6 = vadd.f32 %v499_v3, %v2626_v61  ;;  %vm1244_vm7 = vmor %vm1242_vm6, %vm1243_vm5  ;;  %v1249_v22 = vor.u32 1.1754944e-38, %v1248_v9 }
 0x19d   : > { %1702 = vst.msk [vmem:[%s2629_s21 + $0x20] sm:$0xff] %vm304_vm0, %v1235_v41  ;;  %v1239_v5 = vsub.f32 1.0, %v1238_v51  ;;  %v654_v7 = vadd.f32 %v653_v4, %v2741_v62  ;;  %v454_v8 = vpop.f32.mrf.mxu1  ;;  %v1263_v33 = vand.u32 2147483648, %v2792_v1  ;;  %v1261_v43 = vand.u32 2147483647, %v2792_v1 }
 0x19e   : > { %v455_v10 = vadd.f32 %v454_v8, %v2626_v61  ;;  %v882_v11 = vpop.f32.mrf.mxu0  ;;  %1074 = vst [vmem:[%s2629_s21 + $0x438] sm:$0xff] %v500_v6  ;;  %vm1257_vm10 = vweird.f32 %v2792_v1 }
 0x19f   : > { %v1240_v13 = vmul.f32 %v2116_v63, %v1239_v5  ;;  %v883_v15 = vadd.f32 %v882_v11, %v2725_v36  ;;  %980 = vst [vmem:[%s2629_s21 + $0x88] sm:$0xff] %v654_v7  ;;  %v1264_v2 = vor.u32 1.1754944e-38, %v1263_v33  ;;  %vm1262_vm12 = vcmp.eq.f32.partialorder %v1261_v43, 8.507059e+37 }
 0x1a0   : > { %1883 = vmatmul.msk.f32.gmra.mxu1 %vm304_vm0, %v2571_v53  ;;  %1947 = vmatmul.msk.f32.gmra.mxu3 %vm304_vm0, %v2571_v53  ;;  %1014 = vst [vmem:[%s2629_s21 + $0x1e0] sm:$0xff] %v455_v10 }
 0x1a1   : > { %v2118_v16 = vpop.eup %2117  ;;  %v1241_v18 = vadd.f32 %v2116_v63, %v1240_v13  ;;  %v2003_v20 = vmul.f32 -1.442695, %v883_v15  ;;  %1923 = vmatmul.msk.f32.gmra.mxu2 %vm304_vm0, %v2465_v28  ;;  %1987 = vmatmul.msk.f32.gmra.mxu0 %vm304_vm0, %v2465_v28 }
 0x1a2   : > { %v2120_v21 = vpop.eup %2119  ;;  %v2817_v24 = vadd.f32 1.0, %v2118_v16 }
 0x1a3   : > { %v1245_v53 = vsel %vm1244_vm7, %v2116_v63, %v1241_v18  ;;  %v1253_v25 = vmul.f32 %v2120_v21, %v2792_v1  ;;  %2121 = vpow2.f32 %v2003_v20  ;;  %v502_v23 = vpop.f32.mrf.mxu3  ;;  %vm1258_vm9 = vweird.f32 %v2120_v21 }
 0x1a4   : > { %v1250_v47 = vsel %vm1247_vm8, %v1249_v22, %v1245_v53  ;;  %2123 = vrcp.f32 %v2817_v24  ;;  %v656_v26 = vpop.f32.mrf.mxu2  ;;  %v503_v29 = vadd.f32 %v502_v23, %v2626_v61  ;;  %vm1259_vm11 = vmor %vm1257_vm10, %vm1258_vm9  ;;  %v1278_v9 = vand.u32 2147483648, %v2817_v24 }
 0x1a5   : > { %1703 = vst.msk [vmem:[%s2629_s21 + $0x48] sm:$0xff] %vm304_vm0, %v1250_v47  ;;  %v1254_v27 = vsub.f32 1.0, %v1253_v25  ;;  %v657_v30 = vadd.f32 %v656_v26, %v2741_v62  ;;  %v457_v31 = vpop.f32.mrf.mxu1  ;;  %v1276_v45 = vand.u32 2147483647, %v2817_v24  ;;  %vm1272_vm14 = vweird.f32 %v2817_v24 }
 0x1a6   : > { %v458_v35 = vadd.f32 %v457_v31, %v2626_v61  ;;  %v885_v37 = vpop.f32.mrf.mxu0  ;;  %1078 = vst [vmem:[%s2629_s21 + $0x460] sm:$0xff] %v503_v29  ;;  %v1279_v22 = vor.u32 1.1754944e-38, %v1278_v9 }
 0x1a7   : > { %v1255_v42 = vmul.f32 %v2120_v21, %v1254_v27  ;;  %v886_v48 = vadd.f32 %v885_v37, %v2725_v36  ;;  %984 = vst [vmem:[%s2629_s21 + $0xb0] sm:$0xff] %v657_v30  ;;  %vm1277_vm1 = vcmp.eq.f32.partialorder %v1276_v45, 8.507059e+37 }
 0x1a8   : > { %1884 = vmatmul.msk.f32.gmra.mxu1 %vm304_vm0, %v2583_v55  ;;  %1948 = vmatmul.msk.f32.gmra.mxu3 %vm304_vm0, %v2583_v55  ;;  %1018 = vst [vmem:[%s2629_s21 + $0x208] sm:$0xff] %v458_v35 }
 0x1a9   : > { %v2122_v39 = vpop.eup %2121  ;;  %v1256_v49 = vadd.f32 %v2120_v21, %v1255_v42  ;;  %v2004_v63 = vmul.f32 -1.442695, %v886_v48  ;;  %1924 = vmatmul.msk.f32.gmra.mxu2 %vm304_vm0, %v2479_v32  ;;  %1988 = vmatmul.msk.f32.gmra.mxu0 %vm304_vm0, %v2479_v32 }
 0x1aa   : > { %v2124_v0 = vpop.eup %2123  ;;  %v2842_v51 = vadd.f32 1.0, %v2122_v39 }
 0x1ab   : > { %v1260_v55 = vsel %vm1259_vm11, %v2120_v21, %v1256_v49  ;;  %v1268_v3 = vmul.f32 %v2124_v0, %v2817_v24  ;;  %2125 = vpow2.f32 %v2004_v63  ;;  %v505_v1 = vpop.f32.mrf.mxu3  ;;  %vm1273_vm13 = vweird.f32 %v2124_v0 }
 0x1ac   : > { %v1265_v41 = vsel %vm1262_vm12, %v1264_v2, %v1260_v55  ;;  %2127 = vrcp.f32 %v2842_v51  ;;  %v659_v4 = vpop.f32.mrf.mxu2  ;;  %v506_v6 = vadd.f32 %v505_v1, %v2626_v61  ;;  %vm1274_vm15 = vmor %vm1272_vm14, %vm1273_vm13  ;;  %v1293_v31 = vand.u32 2147483648, %v2842_v51 }
 0x1ad   : > { %1704 = vst.msk [vmem:[%s2629_s21 + $0x70] sm:$0xff] %vm304_vm0, %v1265_v41  ;;  %v1269_v5 = vsub.f32 1.0, %v1268_v3  ;;  %v660_v7 = vadd.f32 %v659_v4, %v2741_v62  ;;  %v460_v8 = vpop.f32.mrf.mxu1  ;;  %v1291_v42 = vand.u32 2147483647, %v2842_v51  ;;  %vm1287_vm3 = vweird.f32 %v2842_v51 }
 0x1ae   : > { %v461_v10 = vadd.f32 %v460_v8, %v2626_v61  ;;  %v888_v11 = vpop.f32.mrf.mxu0  ;;  %1082 = vst [vmem:[%s2629_s21 + $0x488] sm:$0xff] %v506_v6 }
 0x1af   : > { %v1270_v13 = vmul.f32 %v2124_v0, %v1269_v5  ;;  %v889_v15 = vadd.f32 %v888_v11, %v2725_v36  ;;  %988 = vst [vmem:[%s2629_s21 + $0xd8] sm:$0xff] %v660_v7  ;;  %vm1292_vm5 = vcmp.eq.f32.partialorder %v1291_v42, 8.507059e+37 }
 0x1b0   : > { %1885 = vmatmul.msk.f32.gmra.mxu1 %vm304_vm0, %v2595_v57  ;;  %1949 = vmatmul.msk.f32.gmra.mxu3 %vm304_vm0, %v2595_v57  ;;  %1022 = vst [vmem:[%s2629_s21 + $0x230] sm:$0xff] %v461_v10 }
 0x1b1   : > { %v2126_v16 = vpop.eup %2125  ;;  %v1271_v18 = vadd.f32 %v2124_v0, %v1270_v13  ;;  %v2005_v20 = vmul.f32 -1.442695, %v889_v15  ;;  %1925 = vmatmul.msk.f32.gmra.mxu2 %vm304_vm0, %v2487_v34  ;;  %1989 = vmatmul.msk.f32.gmra.mxu0 %vm304_vm0, %v2487_v34 }
 0x1b2   : > { %v2128_v21 = vpop.eup %2127  ;;  %v2867_v53 = vadd.f32 1.0, %v2126_v16 }
 0x1b3   : > { %v1275_v57 = vsel %vm1274_vm15, %v2124_v0, %v1271_v18  ;;  %v1283_v25 = vmul.f32 %v2128_v21, %v2842_v51  ;;  %2129 = vpow2.f32 %v2005_v20  ;;  %v508_v24 = vpop.f32.mrf.mxu3  ;;  %vm1288_vm2 = vweird.f32 %v2128_v21 }
 0x1b4   : > { %v1280_v23 = vsel %vm1277_vm1, %v1279_v22, %v1275_v57  ;;  %2131 = vrcp.f32 %v2867_v53  ;;  %v662_v47 = vpop.f32.mrf.mxu2  ;;  %v509_v27 = vadd.f32 %v508_v24, %v2626_v61  ;;  %vm1289_vm4 = vmor %vm1287_vm3, %vm1288_vm2  ;;  %v1294_v0 = vor.u32 1.1754944e-38, %v1293_v31 }
 0x1b5   : > { %1705 = vst.msk [vmem:[%s2629_s21 + $0x98] sm:$0xff] %vm304_vm0, %v1280_v23  ;;  %v1284_v26 = vsub.f32 1.0, %v1283_v25  ;;  %v663_v29 = vadd.f32 %v662_v47, %v2741_v62  ;;  %v463_v30 = vpop.f32.mrf.mxu1  ;;  %v1308_v8 = vand.u32 2147483648, %v2867_v53  ;;  %v1306_v13 = vand.u32 2147483647, %v2867_v53 }
 0x1b6   : > { %v464_v33 = vadd.f32 %v463_v30, %v2626_v61  ;;  %v891_v35 = vpop.f32.mrf.mxu0  ;;  %1086 = vst [vmem:[%s2629_s21 + $0x4b0] sm:$0xff] %v509_v27  ;;  %vm1302_vm7 = vweird.f32 %v2867_v53  ;;  %v2920_v18 = vperm.slane %v2613_v60, 3 }
 0x1b7   : > { %v1285_v37 = vmul.f32 %v2128_v21, %v1284_v26  ;;  %v892_v43 = vadd.f32 %v891_v35, %v2725_v36  ;;  %992 = vst [vmem:[%s2629_s21 + $0x100] sm:$0xff] %v663_v29  ;;  %vm1307_vm9 = vcmp.eq.f32.partialorder %v1306_v13, 8.507059e+37 }
 0x1b8   : > { %1886 = vmatmul.msk.f32.gmra.mxu1 %vm304_vm0, %v2608_v59  ;;  %1950 = vmatmul.msk.f32.gmra.mxu3 %vm304_vm0, %v2608_v59  ;;  %1026 = vst [vmem:[%s2629_s21 + $0x258] sm:$0xff] %v464_v33  ;;  %v2895_v59 = vperm.slane %v2613_v60, 1 }
 0x1b9   : > { %v2130_v48 = vpop.eup %2129  ;;  %v1286_v39 = vadd.f32 %v2128_v21, %v1285_v37  ;;  %v2006_v49 = vmul.f32 -1.442695, %v892_v43  ;;  %1926 = vmatmul.msk.f32.gmra.mxu2 %vm304_vm0, %v2501_v38  ;;  %1990 = vmatmul.msk.f32.gmra.mxu0 %vm304_vm0, %v2501_v38 }
 0x1ba   : > { %v2132_v63 = vpop.eup %2131  ;;  %v2892_v2 = vadd.f32 1.0, %v2130_v48 }
 0x1bb   : > { %v1290_v55 = vsel %vm1289_vm4, %v2128_v21, %v1286_v39  ;;  %v1298_v51 = vmul.f32 %v2132_v63, %v2867_v53  ;;  %2133 = vpow2.f32 %v2006_v49  ;;  %v511_v3 = vpop.f32.mrf.mxu3  ;;  %vm1303_vm6 = vweird.f32 %v2132_v63 }
 0x1bc   : > { %v1295_v1 = vsel %vm1292_vm5, %v1294_v0, %v1290_v55  ;;  %2135 = vrcp.f32 %v2892_v2  ;;  %v665_v41 = vpop.f32.mrf.mxu2  ;;  %v512_v5 = vadd.f32 %v511_v3, %v2626_v61  ;;  %vm1304_vm8 = vmor %vm1302_vm7, %vm1303_vm6  ;;  %v1323_v27 = vand.u32 2147483648, %v2892_v2 }
 0x1bd   : > { %1706 = vst.msk [vmem:[%s2629_s21 + $0xc0] sm:$0xff] %vm304_vm0, %v1295_v1  ;;  %v1299_v4 = vsub.f32 1.0, %v1298_v51  ;;  %v666_v6 = vadd.f32 %v665_v41, %v2741_v62  ;;  %v531_v7 = vpop.f32.mrf.mxu1  ;;  %v1321_v33 = vand.u32 2147483647, %v2892_v2  ;;  %vm1317_vm11 = vweird.f32 %v2892_v2 }
 0x1be   : > { %v532_v9 = vadd.f32 %v531_v7, %v2895_v59  ;;  %v894_v10 = vpop.f32.mrf.mxu0  ;;  %1090 = vst [vmem:[%s2629_s21 + $0x4d8] sm:$0xff] %v512_v5  ;;  %v1324_v39 = vor.u32 1.1754944e-38, %v1323_v27 }
 0x1bf   : > { %v1300_v11 = vmul.f32 %v2132_v63, %v1299_v4  ;;  %v895_v45 = vadd.f32 %v894_v10, %v2725_v36  ;;  %996 = vst [vmem:[%s2629_s21 + $0x128] sm:$0xff] %v666_v6  ;;  %vm1322_vm13 = vcmp.eq.f32.partialorder %v1321_v33, 8.507059e+37 }
 0x1c0   : > { %1887 = vmatmul.msk.f32.gmra.mxu1 %vm304_vm0, %v2409_v12  ;;  %1951 = vmatmul.msk.f32.gmra.mxu3 %vm304_vm0, %v2409_v12  ;;  %967 = vst [vmem:[%s2629_s21 + $0x8] sm:$0xff] %v532_v9  ;;  %v1309_v12 = vor.u32 1.1754944e-38, %v1308_v8 }
 0x1c1   : > { %v2134_v61 = vpop.eup %2133  ;;  %v1301_v15 = vadd.f32 %v2132_v63, %v1300_v11  ;;  %v2007_v16 = vmul.f32 -1.442695, %v895_v45  ;;  %1927 = vmatmul.msk.f32.gmra.mxu2 %vm304_vm0, %v2509_v40  ;;  %1991 = vmatmul.msk.f32.gmra.mxu0 %vm304_vm0, %v2509_v40 }
 0x1c2   : > { %v2136_v20 = vpop.eup %2135  ;;  %v2923_v21 = vadd.f32 1.0, %v2134_v61 }
 0x1c3   : > { %v1305_v22 = vsel %vm1304_vm8, %v2132_v63, %v1301_v15  ;;  %v1313_v53 = vmul.f32 %v2136_v20, %v2892_v2  ;;  %2137 = vpow2.f32 %v2007_v16  ;;  %v757_v57 = vpop.f32.mrf.mxu3  ;;  %vm1318_vm10 = vweird.f32 %v2136_v20 }
 0x1c4   : > { %v1310_v25 = vsel %vm1307_vm9, %v1309_v12, %v1305_v22  ;;  %2139 = vrcp.f32 %v2923_v21  ;;  %v668_v24 = vpop.f32.mrf.mxu2  ;;  %v758_v47 = vadd.f32 %v757_v57, %v2920_v18  ;;  %vm1319_vm12 = vmor %vm1317_vm11, %vm1318_vm10  ;;  %v1338_v4 = vand.u32 2147483648, %v2923_v21 }
 0x1c5   : > { %1707 = vst.msk [vmem:[%s2629_s21 + $0xe8] sm:$0xff] %vm304_vm0, %v1310_v25  ;;  %v1314_v60 = vsub.f32 1.0, %v1313_v53  ;;  %v669_v23 = vadd.f32 %v668_v24, %v2741_v62  ;;  %v534_v26 = vpop.f32.mrf.mxu1  ;;  %v1336_v8 = vand.u32 2147483647, %v2923_v21  ;;  %vm1332_vm15 = vweird.f32 %v2923_v21 }
 0x1c6   : > { %v535_v29 = vadd.f32 %v534_v26, %v2895_v59  ;;  %v897_v30 = vpop.f32.mrf.mxu0  ;;  %969 = vst [vmem:[%s2629_s21 + $0x18] sm:$0xff] %v758_v47  ;;  %v1339_v61 = vor.u32 1.1754944e-38, %v1338_v4 }
 0x1c7   : > { %v1315_v31 = vmul.f32 %v2136_v20, %v1314_v60  ;;  %1000 = vst [vmem:[%s2629_s21 + $0x150] sm:$0xff] %v669_v23  ;;  %v898_v35 = vadd.f32 %v897_v30, %v2725_v36  ;;  %vm1337_vm2 = vcmp.eq.f32.partialorder %v1336_v8, 8.507059e+37 }
 0x1c8   : > { %1888 = vmatmul.msk.f32.gmra.mxu1 %vm304_vm0, %v2417_v14  ;;  %1952 = vmatmul.msk.f32.gmra.mxu3 %vm304_vm0, %v2417_v14  ;;  %971 = vst [vmem:[%s2629_s21 + $0x30] sm:$0xff] %v535_v29 }
 0x1c9   : > { %v2138_v37 = vpop.eup %2137  ;;  %v1316_v42 = vadd.f32 %v2136_v20, %v1315_v31  ;;  %v2008_v43 = vmul.f32 -1.442695, %v898_v35  ;;  %1928 = vmatmul.msk.f32.gmra.mxu2 %vm304_vm0, %v2527_v44  ;;  %1992 = vmatmul.msk.f32.gmra.mxu0 %vm304_vm0, %v2527_v44 }
 0x1ca   : > { %v2140_v48 = vpop.eup %2139  ;;  %v2948_v49 = vadd.f32 1.0, %v2138_v37 }
 0x1cb   : > { %v1320_v14 = vsel %vm1319_vm12, %v2136_v20, %v1316_v42  ;;  %v1328_v63 = vmul.f32 %v2140_v48, %v2923_v21  ;;  %2141 = vpow2.f32 %v2008_v43  ;;  %v760_v0 = vpop.f32.mrf.mxu3  ;;  %vm1333_vm14 = vweird.f32 %v2140_v48 }
 0x1cc   : > { %v1325_v2 = vsel %vm1322_vm13, %v1324_v39, %v1320_v14  ;;  %2143 = vrcp.f32 %v2948_v49  ;;  %v671_v55 = vpop.f32.mrf.mxu2  ;;  %v761_v1 = vadd.f32 %v760_v0, %v2920_v18  ;;  %vm1334_vm1 = vmor %vm1332_vm15, %vm1333_vm14  ;;  %v1353_v24 = vand.u32 2147483648, %v2948_v49 }
 0x1cd   : > { %1708 = vst.msk [vmem:[%s2629_s21 + $0x110] sm:$0xff] %vm304_vm0, %v1325_v2  ;;  %v1329_v51 = vsub.f32 1.0, %v1328_v63  ;;  %v672_v3 = vadd.f32 %v671_v55, %v2741_v62  ;;  %v537_v41 = vpop.f32.mrf.mxu1  ;;  %v1351_v26 = vand.u32 2147483647, %v2948_v49  ;;  %vm1347_vm4 = vweird.f32 %v2948_v49 }
 0x1ce   : > { %v538_v5 = vadd.f32 %v537_v41, %v2895_v59  ;;  %v900_v6 = vpop.f32.mrf.mxu0  ;;  %973 = vst [vmem:[%s2629_s21 + $0x40] sm:$0xff] %v761_v1  ;;  %v1354_v35 = vor.u32 1.1754944e-38, %v1353_v24 }
 0x1cf   : > { %v1330_v7 = vmul.f32 %v2140_v48, %v1329_v51  ;;  %1004 = vst [vmem:[%s2629_s21 + $0x178] sm:$0xff] %v672_v3  ;;  %v901_v9 = vadd.f32 %v900_v6, %v2725_v36  ;;  %vm1352_vm6 = vcmp.eq.f32.partialorder %v1351_v26, 8.507059e+37 }
 0x1d0   : > { %1889 = vmatmul.msk.f32.gmra.mxu1 %vm304_vm0, %v2428_v17  ;;  %1953 = vmatmul.msk.f32.gmra.mxu3 %vm304_vm0, %v2428_v17  ;;  %975 = vst [vmem:[%s2629_s21 + $0x58] sm:$0xff] %v538_v5 }
 0x1d1   : > { %v2142_v10 = vpop.eup %2141  ;;  %v1331_v11 = vadd.f32 %v2140_v48, %v1330_v7  ;;  %v2009_v13 = vmul.f32 -1.442695, %v901_v9  ;;  %1929 = vmatmul.msk.f32.gmra.mxu2 %vm304_vm0, %v2539_v46  ;;  %1993 = vmatmul.msk.f32.gmra.mxu0 %vm304_vm0, %v2539_v46 }
 0x1d2   : > { %v2144_v45 = vpop.eup %2143  ;;  %v2973_v15 = vadd.f32 1.0, %v2142_v10 }
 0x1d3   : > { %v1335_v17 = vsel %vm1334_vm1, %v2140_v48, %v1331_v11  ;;  %v1343_v16 = vmul.f32 %v2144_v45, %v2948_v49  ;;  %2145 = vpow2.f32 %v2009_v13  ;;  %v763_v20 = vpop.f32.mrf.mxu3  ;;  %vm1348_vm3 = vweird.f32 %v2144_v45 }
 0x1d4   : > { %v1340_v12 = vsel %vm1337_vm2, %v1339_v61, %v1335_v17  ;;  %2147 = vrcp.f32 %v2973_v15  ;;  %v674_v21 = vpop.f32.mrf.mxu2  ;;  %v764_v57 = vadd.f32 %v763_v20, %v2920_v18  ;;  %vm1349_vm5 = vmor %vm1347_vm4, %vm1348_vm3  ;;  %v1368_v2 = vand.u32 2147483648, %v2973_v15 }
 0x1d5   : > { %1709 = vst.msk [vmem:[%s2629_s21 + $0x138] sm:$0xff] %vm304_vm0, %v1340_v12  ;;  %v1344_v22 = vsub.f32 1.0, %v1343_v16  ;;  %v675_v53 = vadd.f32 %v674_v21, %v2741_v62  ;;  %v540_v25 = vpop.f32.mrf.mxu1  ;;  %v1366_v1 = vand.u32 2147483647, %v2973_v15  ;;  %vm1362_vm8 = vweird.f32 %v2973_v15 }
 0x1d6   : > { %v541_v60 = vadd.f32 %v540_v25, %v2895_v59  ;;  %v903_v23 = vpop.f32.mrf.mxu0  ;;  %977 = vst [vmem:[%s2629_s21 + $0x68] sm:$0xff] %v764_v57  ;;  %v1369_v8 = vor.u32 1.1754944e-38, %v1368_v2 }
 0x1d7   : > { %v1345_v47 = vmul.f32 %v2144_v45, %v1344_v22  ;;  %1008 = vst [vmem:[%s2629_s21 + $0x1a0] sm:$0xff] %v675_v53  ;;  %v904_v27 = vadd.f32 %v903_v23, %v2725_v36  ;;  %vm1367_vm10 = vcmp.eq.f32.partialorder %v1366_v1, 8.507059e+37 }
 0x1d8   : > { %1890 = vmatmul.msk.f32.gmra.mxu1 %vm304_vm0, %v2436_v19  ;;  %1954 = vmatmul.msk.f32.gmra.mxu3 %vm304_vm0, %v2436_v19  ;;  %979 = vst [vmem:[%s2629_s21 + $0x80] sm:$0xff] %v541_v60 }
 0x1d9   : > { %v2146_v29 = vpop.eup %2145  ;;  %v1346_v30 = vadd.f32 %v2144_v45, %v1345_v47  ;;  %v2010_v31 = vmul.f32 -1.442695, %v904_v27  ;;  %1930 = vmatmul.msk.f32.gmra.mxu2 %vm304_vm0, %v2557_v50  ;;  %1994 = vmatmul.msk.f32.gmra.mxu0 %vm304_vm0, %v2557_v50 }
 0x1da   : > { %v2148_v33 = vpop.eup %2147  ;;  %v2998_v37 = vadd.f32 1.0, %v2146_v29 }
 0x1db   : > { %v1350_v19 = vsel %vm1349_vm5, %v2144_v45, %v1346_v30  ;;  %v1358_v42 = vmul.f32 %v2148_v33, %v2973_v15  ;;  %2149 = vpow2.f32 %v2010_v31  ;;  %v766_v43 = vpop.f32.mrf.mxu3  ;;  %vm1363_vm7 = vweird.f32 %v2148_v33 }
 0x1dc   : > { %v1355_v48 = vsel %vm1352_vm6, %v1354_v35, %v1350_v19  ;;  %2151 = vrcp.f32 %v2998_v37  ;;  %v677_v39 = vpop.f32.mrf.mxu2  ;;  %v767_v63 = vadd.f32 %v766_v43, %v2920_v18  ;;  %vm1364_vm9 = vmor %vm1362_vm8, %vm1363_vm7  ;;  %v1383_v20 = vand.u32 2147483648, %v2998_v37 }
 0x1dd   : > { %1710 = vst.msk [vmem:[%s2629_s21 + $0x160] sm:$0xff] %vm304_vm0, %v1355_v48  ;;  %v1359_v49 = vsub.f32 1.0, %v1358_v42  ;;  %v678_v14 = vadd.f32 %v677_v39, %v2741_v62  ;;  %v543_v0 = vpop.f32.mrf.mxu1  ;;  %v1381_v53 = vand.u32 2147483647, %v2998_v37  ;;  %vm1377_vm12 = vweird.f32 %v2998_v37 }
 0x1de   : > { %v544_v55 = vadd.f32 %v543_v0, %v2895_v59  ;;  %v906_v51 = vpop.f32.mrf.mxu0  ;;  %981 = vst [vmem:[%s2629_s21 + $0x90] sm:$0xff] %v767_v63  ;;  %v1384_v47 = vor.u32 1.1754944e-38, %v1383_v20 }
 0x1df   : > { %v1360_v3 = vmul.f32 %v2148_v33, %v1359_v49  ;;  %1012 = vst [vmem:[%s2629_s21 + $0x1c8] sm:$0xff] %v678_v14  ;;  %v907_v41 = vadd.f32 %v906_v51, %v2725_v36  ;;  %vm1382_vm14 = vcmp.eq.f32.partialorder %v1381_v53, 8.507059e+37 }
 0x1e0   : > { %1891 = vmatmul.msk.f32.gmra.mxu1 %vm304_vm0, %v2465_v28  ;;  %1955 = vmatmul.msk.f32.gmra.mxu3 %vm304_vm0, %v2465_v28  ;;  %983 = vst [vmem:[%s2629_s21 + $0xa8] sm:$0xff] %v544_v55 }
 0x1e1   : > { %v2150_v4 = vpop.eup %2149  ;;  %v1361_v5 = vadd.f32 %v2148_v33, %v1360_v3  ;;  %v2011_v6 = vmul.f32 -1.442695, %v907_v41  ;;  %1931 = vmatmul.msk.f32.gmra.mxu2 %vm304_vm0, %v2569_v52  ;;  %1995 = vmatmul.msk.f32.gmra.mxu0 %vm304_vm0, %v2569_v52 }
 0x1e2   : > { %v2152_v7 = vpop.eup %2151  ;;  %v3023_v9 = vadd.f32 1.0, %v2150_v4 }
 0x1e3   : > { %v1365_v28 = vsel %vm1364_vm9, %v2148_v33, %v1361_v5  ;;  %v1373_v10 = vmul.f32 %v2152_v7, %v2998_v37  ;;  %2153 = vpow2.f32 %v2011_v6  ;;  %v769_v11 = vpop.f32.mrf.mxu3  ;;  %vm1378_vm11 = vweird.f32 %v2152_v7 }
 0x1e4   : > { %v1370_v13 = vsel %vm1367_vm10, %v1369_v8, %v1365_v28  ;;  %2155 = vrcp.f32 %v3023_v9  ;;  %v680_v45 = vpop.f32.mrf.mxu2  ;;  %v770_v17 = vadd.f32 %v769_v11, %v2920_v18  ;;  %vm1379_vm13 = vmor %vm1377_vm12, %vm1378_vm11  ;;  %v1398_v42 = vand.u32 2147483648, %v3023_v9 }
 0x1e5   : > { %1711 = vst.msk [vmem:[%s2629_s21 + $0x188] sm:$0xff] %vm304_vm0, %v1370_v13  ;;  %v1374_v61 = vsub.f32 1.0, %v1373_v10  ;;  %v681_v15 = vadd.f32 %v680_v45, %v2741_v62  ;;  %v546_v16 = vpop.f32.mrf.mxu1  ;;  %v1396_v49 = vand.u32 2147483647, %v3023_v9  ;;  %vm1392_vm1 = vweird.f32 %v3023_v9 }
 0x1e6   : > { %v547_v12 = vadd.f32 %v546_v16, %v2895_v59  ;;  %v909_v21 = vpop.f32.mrf.mxu0  ;;  %985 = vst [vmem:[%s2629_s21 + $0xb8] sm:$0xff] %v770_v17  ;;  %v1399_v51 = vor.u32 1.1754944e-38, %v1398_v42 }
 0x1e7   : > { %v1375_v22 = vmul.f32 %v2152_v7, %v1374_v61  ;;  %1016 = vst [vmem:[%s2629_s21 + $0x1f0] sm:$0xff] %v681_v15  ;;  %v910_v57 = vadd.f32 %v909_v21, %v2725_v36  ;;  %vm1397_vm3 = vcmp.eq.f32.partialorder %v1396_v49, 8.507059e+37 }
 0x1e8   : > { %1892 = vmatmul.msk.f32.gmra.mxu1 %vm304_vm0, %v2479_v32  ;;  %1956 = vmatmul.msk.f32.gmra.mxu3 %vm304_vm0, %v2479_v32  ;;  %987 = vst [vmem:[%s2629_s21 + $0xd0] sm:$0xff] %v547_v12 }
 0x1e9   : > { %v2154_v25 = vpop.eup %2153  ;;  %v1376_v24 = vadd.f32 %v2152_v7, %v1375_v22  ;;  %v2012_v60 = vmul.f32 -1.442695, %v910_v57  ;;  %1932 = vmatmul.msk.f32.gmra.mxu2 %vm304_vm0, %v2581_v54  ;;  %1996 = vmatmul.msk.f32.gmra.mxu0 %vm304_vm0, %v2581_v54 }
 0x1ea   : > { %v2156_v23 = vpop.eup %2155  ;;  %v3048_v26 = vadd.f32 1.0, %v2154_v25 }
 0x1eb   : > { %v1380_v32 = vsel %vm1379_vm13, %v2152_v7, %v1376_v24  ;;  %v1388_v27 = vmul.f32 %v2156_v23, %v3023_v9  ;;  %2157 = vpow2.f32 %v2012_v60  ;;  %v772_v29 = vpop.f32.mrf.mxu3  ;;  %vm1393_vm15 = vweird.f32 %v2156_v23 }
 0x1ec   : > { %v1385_v30 = vsel %vm1382_vm14, %v1384_v47, %v1380_v32  ;;  %2159 = vrcp.f32 %v3048_v26  ;;  %v683_v31 = vpop.f32.mrf.mxu2  ;;  %v773_v37 = vadd.f32 %v772_v29, %v2920_v18  ;;  %vm1394_vm2 = vmor %vm1392_vm1, %vm1393_vm15  ;;  %v1413_v28 = vand.u32 2147483648, %v3048_v26 }
 0x1ed   : > { %1712 = vst.msk [vmem:[%s2629_s21 + $0x1b0] sm:$0xff] %vm304_vm0, %v1385_v30  ;;  %v1389_v33 = vsub.f32 1.0, %v1388_v27  ;;  %v684_v35 = vadd.f32 %v683_v31, %v2741_v62  ;;  %v549_v19 = vpop.f32.mrf.mxu1  ;;  %v1411_v45 = vand.u32 2147483647, %v3048_v26  ;;  %vm1407_vm5 = vweird.f32 %v3048_v26 }
 0x1ee   : > { %v550_v43 = vadd.f32 %v549_v19, %v2895_v59  ;;  %v912_v48 = vpop.f32.mrf.mxu0  ;;  %989 = vst [vmem:[%s2629_s21 + $0xe0] sm:$0xff] %v773_v37  ;;  %v1414_v12 = vor.u32 1.1754944e-38, %v1413_v28 }
 0x1ef   : > { %v1390_v39 = vmul.f32 %v2156_v23, %v1389_v33  ;;  %1020 = vst [vmem:[%s2629_s21 + $0x218] sm:$0xff] %v684_v35  ;;  %v913_v14 = vadd.f32 %v912_v48, %v2725_v36  ;;  %vm1412_vm7 = vcmp.eq.f32.partialorder %v1411_v45, 8.507059e+37 }
 0x1f0   : > { %1893 = vmatmul.msk.f32.gmra.mxu1 %vm304_vm0, %v2487_v34  ;;  %1957 = vmatmul.msk.f32.gmra.mxu3 %vm304_vm0, %v2487_v34  ;;  %991 = vst [vmem:[%s2629_s21 + $0xf8] sm:$0xff] %v550_v43 }
 0x1f1   : > { %v2158_v63 = vpop.eup %2157  ;;  %v1391_v0 = vadd.f32 %v2156_v23, %v1390_v39  ;;  %v2013_v2 = vmul.f32 -1.442695, %v913_v14  ;;  %1933 = vmatmul.msk.f32.gmra.mxu2 %vm304_vm0, %v2593_v56  ;;  %1997 = vmatmul.msk.f32.gmra.mxu0 %vm304_vm0, %v2593_v56 }
 0x1f2   : > { %v2160_v55 = vpop.eup %2159  ;;  %v3073_v3 = vadd.f32 1.0, %v2158_v63 }
 0x1f3   : > { %v1395_v34 = vsel %vm1394_vm2, %v2156_v23, %v1391_v0  ;;  %v1403_v1 = vmul.f32 %v2160_v55, %v3048_v26  ;;  %2161 = vpow2.f32 %v2013_v2  ;;  %v775_v41 = vpop.f32.mrf.mxu3  ;;  %vm1408_vm4 = vweird.f32 %v2160_v55 }
 0x1f4   : > { %v1400_v4 = vsel %vm1397_vm3, %v1399_v51, %v1395_v34  ;;  %2163 = vrcp.f32 %v3073_v3  ;;  %v686_v5 = vpop.f32.mrf.mxu2  ;;  %v776_v8 = vadd.f32 %v775_v41, %v2920_v18  ;;  %vm1409_vm6 = vmor %vm1407_vm5, %vm1408_vm4  ;;  %v1428_v26 = vand.u32 2147483648, %v3073_v3 }
 0x1f5   : > { %1713 = vst.msk [vmem:[%s2629_s21 + $0x1d8] sm:$0xff] %vm304_vm0, %v1400_v4  ;;  %v1404_v6 = vsub.f32 1.0, %v1403_v1  ;;  %v687_v7 = vadd.f32 %v686_v5, %v2741_v62  ;;  %v552_v9 = vpop.f32.mrf.mxu1  ;;  %v1426_v30 = vand.u32 2147483647, %v3073_v3  ;;  %vm1422_vm9 = vweird.f32 %v3073_v3 }
 0x1f6   : > { %v553_v10 = vadd.f32 %v552_v9, %v2895_v59  ;;  %v915_v11 = vpop.f32.mrf.mxu0  ;;  %993 = vst [vmem:[%s2629_s21 + $0x108] sm:$0xff] %v776_v8  ;;  %v1429_v42 = vor.u32 1.1754944e-38, %v1428_v26 }
 0x1f7   : > { %v1405_v13 = vmul.f32 %v2160_v55, %v1404_v6  ;;  %1024 = vst [vmem:[%s2629_s21 + $0x240] sm:$0xff] %v687_v7  ;;  %v916_v61 = vadd.f32 %v915_v11, %v2725_v36  ;;  %vm1427_vm11 = vcmp.eq.f32.partialorder %v1426_v30, 8.507059e+37 }
 0x1f8   : > { %1894 = vmatmul.msk.f32.gmra.mxu1 %vm304_vm0, %v2501_v38  ;;  %1958 = vmatmul.msk.f32.gmra.mxu3 %vm304_vm0, %v2501_v38  ;;  %995 = vst [vmem:[%s2629_s21 + $0x120] sm:$0xff] %v553_v10 }
 0x1f9   : > { %v2162_v15 = vpop.eup %2161  ;;  %v1406_v17 = vadd.f32 %v2160_v55, %v1405_v13  ;;  %v2014_v16 = vmul.f32 -1.442695, %v916_v61  ;;  %1934 = vmatmul.msk.f32.gmra.mxu2 %vm304_vm0, %v2606_v58  ;;  %1998 = vmatmul.msk.f32.gmra.mxu0 %vm304_vm0, %v2606_v58 }
 0x1fa   : > { %v2164_v20 = vpop.eup %2163  ;;  %v3098_v21 = vadd.f32 1.0, %v2162_v15 }
 0x1fb   : > { %v1410_v38 = vsel %vm1409_vm6, %v2160_v55, %v1406_v17  ;;  %v1418_v22 = vmul.f32 %v2164_v20, %v3073_v3  ;;  %2165 = vpow2.f32 %v2014_v16  ;;  %v778_v53 = vpop.f32.mrf.mxu3  ;;  %vm1423_vm8 = vweird.f32 %v2164_v20 }
 0x1fc   : > { %v1415_v57 = vsel %vm1412_vm7, %v1414_v12, %v1410_v38  ;;  %2167 = vrcp.f32 %v3098_v21  ;;  %v689_v25 = vpop.f32.mrf.mxu2  ;;  %v779_v23 = vadd.f32 %v778_v53, %v2920_v18  ;;  %vm1424_vm10 = vmor %vm1422_vm9, %vm1423_vm8  ;;  %v1443_v51 = vand.u32 2147483648, %v3098_v21 }
 0x1fd   : > { %1714 = vst.msk [vmem:[%s2629_s21 + $0x200] sm:$0xff] %vm304_vm0, %v1415_v57  ;;  %v1419_v24 = vsub.f32 1.0, %v1418_v22  ;;  %v690_v60 = vadd.f32 %v689_v25, %v2741_v62  ;;  %v555_v47 = vpop.f32.mrf.mxu1  ;;  %v1441_v41 = vand.u32 2147483647, %v3098_v21  ;;  %vm1437_vm13 = vweird.f32 %v3098_v21 }
 0x1fe   : > { %v556_v32 = vadd.f32 %v555_v47, %v2895_v59  ;;  %v918_v27 = vpop.f32.mrf.mxu0  ;;  %997 = vst [vmem:[%s2629_s21 + $0x130] sm:$0xff] %v779_v23  ;;  %v1444_v9 = vor.u32 1.1754944e-38, %v1443_v51 }
 0x1ff   : > { %v1420_v29 = vmul.f32 %v2164_v20, %v1419_v24  ;;  %1028 = vst [vmem:[%s2629_s21 + $0x268] sm:$0xff] %v690_v60  ;;  %v919_v31 = vadd.f32 %v918_v27, %v2725_v36  ;;  %vm1442_vm15 = vcmp.eq.f32.partialorder %v1441_v41, 8.507059e+37 }
 0x200   : > { %1895 = vmatmul.msk.f32.gmra.mxu1 %vm304_vm0, %v2509_v40  ;;  %1959 = vmatmul.msk.f32.gmra.mxu3 %vm304_vm0, %v2509_v40  ;;  %999 = vst [vmem:[%s2629_s21 + $0x148] sm:$0xff] %v556_v32 }
 0x201   : > { %v2166_v33 = vpop.eup %2165  ;;  %v1421_v35 = vadd.f32 %v2164_v20, %v1420_v29  ;;  %v2015_v37 = vmul.f32 -1.442695, %v919_v31 }
 0x202   : > { %v2168_v19 = vpop.eup %2167  ;;  %v3118_v43 = vadd.f32 1.0, %v2166_v33 }
 0x203   : > { %v1425_v48 = vsel %vm1424_vm10, %v2164_v20, %v1421_v35  ;;  %v1433_v39 = vmul.f32 %v2168_v19, %v3098_v21  ;;  %2169 = vpow2.f32 %v2015_v37  ;;  %v781_v49 = vpop.f32.mrf.mxu3  ;;  %vm1438_vm12 = vweird.f32 %v2168_v19 }
 0x204   : > { %v1430_v40 = vsel %vm1427_vm11, %v1429_v42, %v1425_v48  ;;  %2171 = vrcp.f32 %v3118_v43  ;;  %v692_v14 = vpop.f32.mrf.mxu2  ;;  %v782_v2 = vadd.f32 %v781_v49, %v2920_v18  ;;  %vm1439_vm14 = vmor %vm1437_vm13, %vm1438_vm12  ;;  %v1458_v20 = vand.u32 2147483648, %v3118_v43 }
 0x205   : > { %1715 = vst.msk [vmem:[%s2629_s21 + $0x228] sm:$0xff] %vm304_vm0, %v1430_v40  ;;  %v1434_v63 = vsub.f32 1.0, %v1433_v39  ;;  %v693_v0 = vadd.f32 %v692_v14, %v2741_v62  ;;  %v558_v55 = vpop.f32.mrf.mxu1  ;;  %v1456_v22 = vand.u32 2147483647, %v3118_v43  ;;  %vm1452_vm2 = vweird.f32 %v3118_v43 }
 0x206   : > { %v559_v3 = vadd.f32 %v558_v55, %v2895_v59  ;;  %v921_v34 = vpop.f32.mrf.mxu0  ;;  %1001 = vst [vmem:[%s2629_s21 + $0x158] sm:$0xff] %v782_v2  ;;  %v1459_v23 = vor.u32 1.1754944e-38, %v1458_v20 }
 0x207   : > { %v1435_v1 = vmul.f32 %v2168_v19, %v1434_v63  ;;  %1032 = vst [vmem:[%s2629_s21 + $0x290] sm:$0xff] %v693_v0  ;;  %v922_v4 = vadd.f32 %v921_v34, %v2725_v36  ;;  %vm1457_vm4 = vcmp.eq.f32.partialorder %v1456_v22, 8.507059e+37 }
 0x208   : > { %1896 = vmatmul.msk.f32.gmra.mxu1 %vm304_vm0, %v2527_v44  ;;  %1960 = vmatmul.msk.f32.gmra.mxu3 %vm304_vm0, %v2527_v44  ;;  %1003 = vst [vmem:[%s2629_s21 + $0x170] sm:$0xff] %v559_v3 }
 0x209   : > { %v2170_v5 = vpop.eup %2169  ;;  %v1436_v6 = vadd.f32 %v2168_v19, %v1435_v1  ;;  %v2016_v7 = vmul.f32 -1.442695, %v922_v4 }
 0x20a   : > { %v2172_v8 = vpop.eup %2171  ;;  %v3138_v28 = vadd.f32 1.0, %v2170_v5 }
 0x20b   : > { %v1440_v10 = vsel %vm1439_vm14, %v2168_v19, %v1436_v6  ;;  %v1448_v11 = vmul.f32 %v2172_v8, %v3118_v43  ;;  %2173 = vpow2.f32 %v2016_v7  ;;  %v784_v13 = vpop.f32.mrf.mxu3  ;;  %vm1453_vm1 = vweird.f32 %v2172_v8 }
 0x20c   : > { %v1445_v44 = vsel %vm1442_vm15, %v1444_v9, %v1440_v10  ;;  %2175 = vrcp.f32 %v3138_v28  ;;  %v695_v45 = vpop.f32.mrf.mxu2  ;;  %v785_v17 = vadd.f32 %v784_v13, %v2920_v18  ;;  %vm1454_vm3 = vmor %vm1452_vm2, %vm1453_vm1  ;;  %v1473_v37 = vand.u32 2147483648, %v3138_v28 }
 0x20d   : > { %1716 = vst.msk [vmem:[%s2629_s21 + $0x250] sm:$0xff] %vm304_vm0, %v1445_v44  ;;  %v1449_v61 = vsub.f32 1.0, %v1448_v11  ;;  %v696_v15 = vadd.f32 %v695_v45, %v2741_v62  ;;  %v561_v16 = vpop.f32.mrf.mxu1  ;;  %v1471_v48 = vand.u32 2147483647, %v3138_v28  ;;  %vm1467_vm6 = vweird.f32 %v3138_v28 }
 0x20e   : > { %v562_v12 = vadd.f32 %v561_v16, %v2895_v59  ;;  %v924_v21 = vpop.f32.mrf.mxu0  ;;  %1005 = vst [vmem:[%s2629_s21 + $0x180] sm:$0xff] %v785_v17  ;;  %v1474_v0 = vor.u32 1.1754944e-38, %v1473_v37 }
 0x20f   : > { %v1450_v38 = vmul.f32 %v2172_v8, %v1449_v61  ;;  %1036 = vst [vmem:[%s2629_s21 + $0x2b8] sm:$0xff] %v696_v15  ;;  %v925_v53 = vadd.f32 %v924_v21, %v2725_v36  ;;  %vm1472_vm8 = vcmp.eq.f32.partialorder %v1471_v48, 8.507059e+37 }
 0x210   : > { %1897 = vmatmul.msk.f32.gmra.mxu1 %vm304_vm0, %v2539_v46  ;;  %1961 = vmatmul.msk.f32.gmra.mxu3 %vm304_vm0, %v2539_v46  ;;  %1007 = vst [vmem:[%s2629_s21 + $0x198] sm:$0xff] %v562_v12 }
 0x211   : > { %v2174_v57 = vpop.eup %2173  ;;  %v1451_v25 = vadd.f32 %v2172_v8, %v1450_v38  ;;  %v2017_v24 = vmul.f32 -1.442695, %v925_v53 }
 0x212   : > { %v2176_v60 = vpop.eup %2175  ;;  %v3158_v47 = vadd.f32 1.0, %v2174_v57 }
 0x213   : > { %v1455_v26 = vsel %vm1454_vm3, %v2172_v8, %v1451_v25  ;;  %v1463_v32 = vmul.f32 %v2176_v60, %v3138_v28  ;;  %2177 = vpow2.f32 %v2017_v24  ;;  %v787_v27 = vpop.f32.mrf.mxu3  ;;  %vm1468_vm5 = vweird.f32 %v2176_v60 }
 0x214   : > { %v1460_v46 = vsel %vm1457_vm4, %v1459_v23, %v1455_v26  ;;  %2179 = vrcp.f32 %v3158_v47  ;;  %v698_v29 = vpop.f32.mrf.mxu2  ;;  %v788_v33 = vadd.f32 %v787_v27, %v2920_v18  ;;  %vm1469_vm7 = vmor %vm1467_vm6, %vm1468_vm5  ;;  %v1488_v6 = vand.u32 2147483648, %v3158_v47 }
 0x215   : > { %1717 = vst.msk [vmem:[%s2629_s21 + $0x278] sm:$0xff] %vm304_vm0, %v1460_v46  ;;  %v1464_v30 = vsub.f32 1.0, %v1463_v32  ;;  %v699_v31 = vadd.f32 %v698_v29, %v2741_v62  ;;  %v564_v35 = vpop.f32.mrf.mxu1  ;;  %v1486_v28 = vand.u32 2147483647, %v3158_v47  ;;  %vm1482_vm10 = vweird.f32 %v3158_v47 }
 0x216   : > { %v565_v19 = vadd.f32 %v564_v35, %v2895_v59  ;;  %v927_v42 = vpop.f32.mrf.mxu0  ;;  %1009 = vst [vmem:[%s2629_s21 + $0x1a8] sm:$0xff] %v788_v33  ;;  %v1489_v61 = vor.u32 1.1754944e-38, %v1488_v6 }
 0x217   : > { %v1465_v43 = vmul.f32 %v2176_v60, %v1464_v30  ;;  %1040 = vst [vmem:[%s2629_s21 + $0x2e0] sm:$0xff] %v699_v31  ;;  %v928_v39 = vadd.f32 %v927_v42, %v2725_v36  ;;  %vm1487_vm12 = vcmp.eq.f32.partialorder %v1486_v28, 8.507059e+37 }
 0x218   : > { %1898 = vmatmul.msk.f32.gmra.mxu1 %vm304_vm0, %v2557_v50  ;;  %1962 = vmatmul.msk.f32.gmra.mxu3 %vm304_vm0, %v2557_v50  ;;  %1011 = vst [vmem:[%s2629_s21 + $0x1c0] sm:$0xff] %v565_v19 }
 0x219   : > { %v2178_v49 = vpop.eup %2177  ;;  %v1466_v40 = vadd.f32 %v2176_v60, %v1465_v43  ;;  %v2018_v14 = vmul.f32 -1.442695, %v928_v39 }
 0x21a   : > { %v2180_v63 = vpop.eup %2179  ;;  %v3178_v2 = vadd.f32 1.0, %v2178_v49 }
 0x21b   : > { %v1470_v55 = vsel %vm1469_vm7, %v2176_v60, %v1466_v40  ;;  %v1478_v51 = vmul.f32 %v2180_v63, %v3158_v47  ;;  %2181 = vpow2.f32 %v2018_v14  ;;  %v790_v3 = vpop.f32.mrf.mxu3  ;;  %vm1483_vm9 = vweird.f32 %v2180_v63 }
 0x21c   : > { %v1475_v50 = vsel %vm1472_vm8, %v1474_v0, %v1470_v55  ;;  %2183 = vrcp.f32 %v3178_v2  ;;  %v701_v34 = vpop.f32.mrf.mxu2  ;;  %v791_v4 = vadd.f32 %v790_v3, %v2920_v18  ;;  %vm1484_vm11 = vmor %vm1482_vm10, %vm1483_vm9  ;;  %v1503_v57 = vand.u32 2147483648, %v3178_v2 }
 0x21d   : > { %1718 = vst.msk [vmem:[%s2629_s21 + $0x2a0] sm:$0xff] %vm304_vm0, %v1475_v50  ;;  %v1479_v1 = vsub.f32 1.0, %v1478_v51  ;;  %v702_v41 = vadd.f32 %v701_v34, %v2741_v62  ;;  %v567_v5 = vpop.f32.mrf.mxu1  ;;  %v1501_v23 = vand.u32 2147483647, %v3178_v2  ;;  %vm1497_vm14 = vweird.f32 %v3178_v2 }
 0x21e   : > { %v568_v7 = vadd.f32 %v567_v5, %v2895_v59  ;;  %v930_v8 = vpop.f32.mrf.mxu0  ;;  %1013 = vst [vmem:[%s2629_s21 + $0x1d0] sm:$0xff] %v791_v4  ;;  %v1504_v29 = vor.u32 1.1754944e-38, %v1503_v57 }
 0x21f   : > { %v1480_v9 = vmul.f32 %v2180_v63, %v1479_v1  ;;  %1044 = vst [vmem:[%s2629_s21 + $0x308] sm:$0xff] %v702_v41  ;;  %v931_v10 = vadd.f32 %v930_v8, %v2725_v36  ;;  %vm1502_vm1 = vcmp.eq.f32.partialorder %v1501_v23, 8.507059e+37 }
 0x220   : > { %1899 = vmatmul.msk.f32.gmra.mxu1 %vm304_vm0, %v2569_v52  ;;  %1963 = vmatmul.msk.f32.gmra.mxu3 %vm304_vm0, %v2569_v52  ;;  %1015 = vst [vmem:[%s2629_s21 + $0x1e8] sm:$0xff] %v568_v7 }
 0x221   : > { %v2182_v11 = vpop.eup %2181  ;;  %v1481_v13 = vadd.f32 %v2180_v63, %v1480_v9  ;;  %v2019_v44 = vmul.f32 -1.442695, %v931_v10 }
 0x222   : > { %v2184_v45 = vpop.eup %2183  ;;  %v3198_v15 = vadd.f32 1.0, %v2182_v11 }
 0x223   : > { %v1485_v17 = vsel %vm1484_vm11, %v2180_v63, %v1481_v13  ;;  %v1493_v16 = vmul.f32 %v2184_v45, %v3178_v2  ;;  %2185 = vpow2.f32 %v2019_v44  ;;  %v793_v20 = vpop.f32.mrf.mxu3  ;;  %vm1498_vm13 = vweird.f32 %v2184_v45 }
 0x224   : > { %v1490_v52 = vsel %vm1487_vm12, %v1489_v61, %v1485_v17  ;;  %2187 = vrcp.f32 %v3198_v15  ;;  %v704_v12 = vpop.f32.mrf.mxu2  ;;  %v794_v22 = vadd.f32 %v793_v20, %v2920_v18  ;;  %vm1499_vm15 = vmor %vm1497_vm14, %vm1498_vm13  ;;  %v1518_v39 = vand.u32 2147483648, %v3198_v15 }
 0x225   : > { %1719 = vst.msk [vmem:[%s2629_s21 + $0x2c8] sm:$0xff] %vm304_vm0, %v1490_v52  ;;  %v1494_v21 = vsub.f32 1.0, %v1493_v16  ;;  %v705_v38 = vadd.f32 %v704_v12, %v2741_v62  ;;  %v570_v53 = vpop.f32.mrf.mxu1  ;;  %v1516_v63 = vand.u32 2147483647, %v3198_v15  ;;  %vm1512_vm3 = vweird.f32 %v3198_v15 }
 0x226   : > { %v571_v25 = vadd.f32 %v570_v53, %v2895_v59  ;;  %v933_v24 = vpop.f32.mrf.mxu0  ;;  %1017 = vst [vmem:[%s2629_s21 + $0x1f8] sm:$0xff] %v794_v22  ;;  %v1519_v50 = vor.u32 1.1754944e-38, %v1518_v39 }
 0x227   : > { %v1495_v60 = vmul.f32 %v2184_v45, %v1494_v21  ;;  %1048 = vst [vmem:[%s2629_s21 + $0x330] sm:$0xff] %v705_v38  ;;  %v934_v47 = vadd.f32 %v933_v24, %v2725_v36  ;;  %vm1517_vm5 = vcmp.eq.f32.partialorder %v1516_v63, 8.507059e+37 }
 0x228   : > { %1900 = vmatmul.msk.f32.gmra.mxu1 %vm304_vm0, %v2581_v54  ;;  %1964 = vmatmul.msk.f32.gmra.mxu3 %vm304_vm0, %v2581_v54  ;;  %1019 = vst [vmem:[%s2629_s21 + $0x210] sm:$0xff] %v571_v25 }
 0x229   : > { %v2186_v26 = vpop.eup %2185  ;;  %v1496_v32 = vadd.f32 %v2184_v45, %v1495_v60  ;;  %v2020_v27 = vmul.f32 -1.442695, %v934_v47 }
 0x22a   : > { %v2188_v46 = vpop.eup %2187  ;;  %v3218_v30 = vadd.f32 1.0, %v2186_v26 }
 0x22b   : > { %v1500_v31 = vsel %vm1499_vm15, %v2184_v45, %v1496_v32  ;;  %v1508_v33 = vmul.f32 %v2188_v46, %v3198_v15  ;;  %2189 = vpow2.f32 %v2020_v27  ;;  %v796_v35 = vpop.f32.mrf.mxu3  ;;  %vm1513_vm2 = vweird.f32 %v2188_v46 }
 0x22c   : > { %v1505_v54 = vsel %vm1502_vm1, %v1504_v29, %v1500_v31  ;;  %2191 = vrcp.f32 %v3218_v30  ;;  %v707_v37 = vpop.f32.mrf.mxu2  ;;  %v797_v43 = vadd.f32 %v796_v35, %v2920_v18  ;;  %vm1514_vm4 = vmor %vm1512_vm3, %vm1513_vm2  ;;  %v1533_v28 = vand.u32 2147483648, %v3218_v30 }
 0x22d   : > { %1720 = vst.msk [vmem:[%s2629_s21 + $0x2f0] sm:$0xff] %vm304_vm0, %v1505_v54  ;;  %v1509_v19 = vsub.f32 1.0, %v1508_v33  ;;  %v708_v42 = vadd.f32 %v707_v37, %v2741_v62  ;;  %v573_v48 = vpop.f32.mrf.mxu1  ;;  %v1531_v44 = vand.u32 2147483647, %v3218_v30  ;;  %vm1527_vm7 = vweird.f32 %v3218_v30 }
 0x22e   : > { %v574_v49 = vadd.f32 %v573_v48, %v2895_v59  ;;  %v936_v40 = vpop.f32.mrf.mxu0  ;;  %1021 = vst [vmem:[%s2629_s21 + $0x220] sm:$0xff] %v797_v43  ;;  %v1534_v20 = vor.u32 1.1754944e-38, %v1533_v28 }
 0x22f   : > { %v1510_v14 = vmul.f32 %v2188_v46, %v1509_v19  ;;  %1052 = vst [vmem:[%s2629_s21 + $0x358] sm:$0xff] %v708_v42  ;;  %v937_v0 = vadd.f32 %v936_v40, %v2725_v36  ;;  %vm1532_vm9 = vcmp.eq.f32.partialorder %v1531_v44, 8.507059e+37 }
 0x230   : > { %1901 = vmatmul.msk.f32.gmra.mxu1 %vm304_vm0, %v2593_v56  ;;  %1965 = vmatmul.msk.f32.gmra.mxu3 %vm304_vm0, %v2593_v56  ;;  %1023 = vst [vmem:[%s2629_s21 + $0x238] sm:$0xff] %v574_v49 }
 0x231   : > { %v2190_v2 = vpop.eup %2189  ;;  %v1511_v55 = vadd.f32 %v2188_v46, %v1510_v14  ;;  %v2021_v51 = vmul.f32 -1.442695, %v937_v0 }
 0x232   : > { %v2192_v3 = vpop.eup %2191  ;;  %v3238_v34 = vadd.f32 1.0, %v2190_v2 }
 0x233   : > { %v1515_v1 = vsel %vm1514_vm4, %v2188_v46, %v1511_v55  ;;  %v1523_v41 = vmul.f32 %v2192_v3, %v3218_v30  ;;  %2193 = vpow2.f32 %v2021_v51  ;;  %v799_v4 = vpop.f32.mrf.mxu3  ;;  %vm1528_vm6 = vweird.f32 %v2192_v3 }
 0x234   : > { %v1520_v56 = vsel %vm1517_vm5, %v1519_v50, %v1515_v1  ;;  %2195 = vrcp.f32 %v3238_v34  ;;  %v710_v5 = vpop.f32.mrf.mxu2  ;;  %v800_v8 = vadd.f32 %v799_v4, %v2920_v18  ;;  %vm1529_vm8 = vmor %vm1527_vm7, %vm1528_vm6  ;;  %v1548_v60 = vand.u32 2147483648, %v3238_v34 }
 0x235   : > { %1721 = vst.msk [vmem:[%s2629_s21 + $0x318] sm:$0xff] %vm304_vm0, %v1520_v56  ;;  %v1524_v6 = vsub.f32 1.0, %v1523_v41  ;;  %v711_v7 = vadd.f32 %v710_v5, %v2741_v62  ;;  %v576_v9 = vpop.f32.mrf.mxu1  ;;  %v1546_v32 = vand.u32 2147483647, %v3238_v34  ;;  %vm1542_vm11 = vweird.f32 %v3238_v34 }
 0x236   : > { %v577_v10 = vadd.f32 %v576_v9, %v2895_v59  ;;  %v939_v11 = vpop.f32.mrf.mxu0  ;;  %1025 = vst [vmem:[%s2629_s21 + $0x248] sm:$0xff] %v800_v8  ;;  %v1549_v33 = vor.u32 1.1754944e-38, %v1548_v60 }
 0x237   : > { %v1525_v13 = vmul.f32 %v2192_v3, %v1524_v6  ;;  %1056 = vst [vmem:[%s2629_s21 + $0x380] sm:$0xff] %v711_v7  ;;  %v940_v45 = vadd.f32 %v939_v11, %v2725_v36  ;;  %vm1547_vm13 = vcmp.eq.f32.partialorder %v1546_v32, 8.507059e+37 }
 0x238   : > { %1902 = vmatmul.msk.f32.gmra.mxu1 %vm304_vm0, %v2606_v58  ;;  %1966 = vmatmul.msk.f32.gmra.mxu3 %vm304_vm0, %v2606_v58  ;;  %1027 = vst [vmem:[%s2629_s21 + $0x260] sm:$0xff] %v577_v10 }
 0x239   : > { %v2194_v61 = vpop.eup %2193  ;;  %v1526_v15 = vadd.f32 %v2192_v3, %v1525_v13  ;;  %v2022_v17 = vmul.f32 -1.442695, %v940_v45 }
 0x23a   : > { %v2196_v16 = vpop.eup %2195  ;;  %v3258_v52 = vadd.f32 1.0, %v2194_v61 }
 0x23b   : > { %v1530_v12 = vsel %vm1529_vm8, %v2192_v3, %v1526_v15  ;;  %v1538_v21 = vmul.f32 %v2196_v16, %v3238_v34  ;;  %2197 = vpow2.f32 %v2022_v17  ;;  %v802_v38 = vpop.f32.mrf.mxu3  ;;  %vm1543_vm10 = vweird.f32 %v2196_v16 }
 0x23c   : > { %v1535_v58 = vsel %vm1532_vm9, %v1534_v20, %v1530_v12  ;;  %2199 = vrcp.f32 %v3258_v52  ;;  %v713_v22 = vpop.f32.mrf.mxu2  ;;  %v803_v25 = vadd.f32 %v802_v38, %v2920_v18  ;;  %vm1544_vm12 = vmor %vm1542_vm11, %vm1543_vm10  ;;  %v1563_v14 = vand.u32 2147483648, %v3258_v52 }
 0x23d   : > { %1722 = vst.msk [vmem:[%s2629_s21 + $0x340] sm:$0xff] %vm304_vm0, %v1535_v58  ;;  %v1539_v53 = vsub.f32 1.0, %v1538_v21  ;;  %v714_v57 = vadd.f32 %v713_v22, %v2741_v62  ;;  %v579_v24 = vpop.f32.mrf.mxu1  ;;  %v1561_v55 = vand.u32 2147483647, %v3258_v52  ;;  %vm1557_vm15 = vweird.f32 %v3258_v52 }
 0x23e   : > { %v580_v23 = vadd.f32 %v579_v24, %v2895_v59  ;;  %v942_v47 = vpop.f32.mrf.mxu0  ;;  %1029 = vst [vmem:[%s2629_s21 + $0x270] sm:$0xff] %v803_v25  ;;  %v1564_v41 = vor.u32 1.1754944e-38, %v1563_v14 }
 0x23f   : > { %v1540_v26 = vmul.f32 %v2196_v16, %v1539_v53  ;;  %1060 = vst [vmem:[%s2629_s21 + $0x3a8] sm:$0xff] %v714_v57  ;;  %v943_v27 = vadd.f32 %v942_v47, %v2725_v36  ;;  %vm1562_vm2 = vcmp.eq.f32.partialorder %v1561_v55, 8.507059e+37 }
 0x240   : > { %1031 = vst [vmem:[%s2629_s21 + $0x288] sm:$0xff] %v580_v23 }
 0x241   : > { %v2198_v46 = vpop.eup %2197  ;;  %v1541_v29 = vadd.f32 %v2196_v16, %v1540_v26  ;;  %v2023_v30 = vmul.f32 -1.442695, %v943_v27 }
 0x242   : > { %v2200_v31 = vpop.eup %2199  ;;  %v3274_v35 = vadd.f32 1.0, %v2198_v46 }
 0x243   : > { %v1545_v54 = vsel %vm1544_vm12, %v2196_v16, %v1541_v29  ;;  %v1553_v37 = vmul.f32 %v2200_v31, %v3258_v52  ;;  %2201 = vpow2.f32 %v2023_v30  ;;  %v805_v19 = vpop.f32.mrf.mxu3  ;;  %vm1558_vm14 = vweird.f32 %v2200_v31 }
 0x244   : > { %v1550_v42 = vsel %vm1547_vm13, %v1549_v33, %v1545_v54  ;;  %2203 = vrcp.f32 %v3274_v35  ;;  %v716_v43 = vpop.f32.mrf.mxu2  ;;  %v806_v49 = vadd.f32 %v805_v19, %v2920_v18  ;;  %vm1559_vm1 = vmor %vm1557_vm15, %vm1558_vm14  ;;  %v1578_v13 = vand.u32 2147483648, %v3274_v35 }
 0x245   : > { %1723 = vst.msk [vmem:[%s2629_s21 + $0x368] sm:$0xff] %vm304_vm0, %v1550_v42  ;;  %v1554_v48 = vsub.f32 1.0, %v1553_v37  ;;  %v717_v39 = vadd.f32 %v716_v43, %v2741_v62  ;;  %v582_v40 = vpop.f32.mrf.mxu1  ;;  %v1576_v15 = vand.u32 2147483647, %v3274_v35  ;;  %vm1572_vm4 = vweird.f32 %v3274_v35 }
 0x246   : > { %v583_v63 = vadd.f32 %v582_v40, %v2895_v59  ;;  %v945_v0 = vpop.f32.mrf.mxu0  ;;  %1033 = vst [vmem:[%s2629_s21 + $0x298] sm:$0xff] %v806_v49  ;;  %v1579_v21 = vor.u32 1.1754944e-38, %v1578_v13 }
 0x247   : > { %v1555_v2 = vmul.f32 %v2200_v31, %v1554_v48  ;;  %1064 = vst [vmem:[%s2629_s21 + $0x3d0] sm:$0xff] %v717_v39  ;;  %v946_v51 = vadd.f32 %v945_v0, %v2725_v36  ;;  %vm1577_vm6 = vcmp.eq.f32.partialorder %v1576_v15, 8.507059e+37 }
 0x248   : > { %1035 = vst [vmem:[%s2629_s21 + $0x2b0] sm:$0xff] %v583_v63 }
 0x249   : > { %v2202_v3 = vpop.eup %2201  ;;  %v1556_v50 = vadd.f32 %v2200_v31, %v1555_v2  ;;  %v2024_v34 = vmul.f32 -1.442695, %v946_v51 }
 0x24a   : > { %v2204_v1 = vpop.eup %2203  ;;  %v3290_v4 = vadd.f32 1.0, %v2202_v3 }
 0x24b   : > { %v1560_v56 = vsel %vm1559_vm1, %v2200_v31, %v1556_v50  ;;  %v1568_v5 = vmul.f32 %v2204_v1, %v3274_v35  ;;  %2205 = vpow2.f32 %v2024_v34  ;;  %v808_v6 = vpop.f32.mrf.mxu3  ;;  %vm1573_vm3 = vweird.f32 %v2204_v1 }
 0x24c   : > { %v1565_v7 = vsel %vm1562_vm2, %v1564_v41, %v1560_v56  ;;  %2207 = vrcp.f32 %v3290_v4  ;;  %v719_v8 = vpop.f32.mrf.mxu2  ;;  %v809_v10 = vadd.f32 %v808_v6, %v2920_v18  ;;  %vm1574_vm5 = vmor %vm1572_vm4, %vm1573_vm3  ;;  %v1593_v26 = vand.u32 2147483648, %v3290_v4 }
 0x24d   : > { %1724 = vst.msk [vmem:[%s2629_s21 + $0x390] sm:$0xff] %vm304_vm0, %v1565_v7  ;;  %v1569_v9 = vsub.f32 1.0, %v1568_v5  ;;  %v720_v28 = vadd.f32 %v719_v8, %v2741_v62  ;;  %v585_v11 = vpop.f32.mrf.mxu1  ;;  %v1591_v29 = vand.u32 2147483647, %v3290_v4  ;;  %vm1587_vm8 = vweird.f32 %v3290_v4 }
 0x24e   : > { %v586_v44 = vadd.f32 %v585_v11, %v2895_v59  ;;  %v948_v45 = vpop.f32.mrf.mxu0  ;;  %1037 = vst [vmem:[%s2629_s21 + $0x2c0] sm:$0xff] %v809_v10  ;;  %v1594_v37 = vor.u32 1.1754944e-38, %v1593_v26 }
 0x24f   : > { %v1570_v61 = vmul.f32 %v2204_v1, %v1569_v9  ;;  %1068 = vst [vmem:[%s2629_s21 + $0x3f8] sm:$0xff] %v720_v28  ;;  %v949_v17 = vadd.f32 %v948_v45, %v2725_v36  ;;  %vm1592_vm10 = vcmp.eq.f32.partialorder %v1591_v29, 8.507059e+37 }
 0x250   : > { %1039 = vst [vmem:[%s2629_s21 + $0x2d8] sm:$0xff] %v586_v44 }
 0x251   : > { %v2206_v16 = vpop.eup %2205  ;;  %v1571_v20 = vadd.f32 %v2204_v1, %v1570_v61  ;;  %v2025_v52 = vmul.f32 -1.442695, %v949_v17 }
 0x252   : > { %v2208_v12 = vpop.eup %2207  ;;  %v3306_v38 = vadd.f32 1.0, %v2206_v16 }
 0x253   : > { %v1575_v58 = vsel %vm1574_vm5, %v2204_v1, %v1571_v20  ;;  %v1583_v22 = vmul.f32 %v2208_v12, %v3290_v4  ;;  %2209 = vpow2.f32 %v2025_v52  ;;  %v811_v53 = vpop.f32.mrf.mxu3  ;;  %vm1588_vm7 = vweird.f32 %v2208_v12 }
 0x254   : > { %v1580_v57 = vsel %vm1577_vm6, %v1579_v21, %v1575_v58  ;;  %2211 = vrcp.f32 %v3306_v38  ;;  %v722_v25 = vpop.f32.mrf.mxu2  ;;  %v812_v23 = vadd.f32 %v811_v53, %v2920_v18  ;;  %vm1589_vm9 = vmor %vm1587_vm8, %vm1588_vm7  ;;  %v1608_v2 = vand.u32 2147483648, %v3306_v38 }
 0x255   : > { %1725 = vst.msk [vmem:[%s2629_s21 + $0x3b8] sm:$0xff] %vm304_vm0, %v1580_v57  ;;  %v1584_v24 = vsub.f32 1.0, %v1583_v22  ;;  %v723_v60 = vadd.f32 %v722_v25, %v2741_v62  ;;  %v588_v47 = vpop.f32.mrf.mxu1  ;;  %v1606_v50 = vand.u32 2147483647, %v3306_v38  ;;  %vm1602_vm12 = vweird.f32 %v3306_v38 }
 0x256   : > { %v589_v32 = vadd.f32 %v588_v47, %v2895_v59  ;;  %v951_v27 = vpop.f32.mrf.mxu0  ;;  %1041 = vst [vmem:[%s2629_s21 + $0x2e8] sm:$0xff] %v812_v23  ;;  %v1609_v5 = vor.u32 1.1754944e-38, %v1608_v2 }
 0x257   : > { %v1585_v46 = vmul.f32 %v2208_v12, %v1584_v24  ;;  %1072 = vst [vmem:[%s2629_s21 + $0x420] sm:$0xff] %v723_v60  ;;  %v952_v30 = vadd.f32 %v951_v27, %v2725_v36  ;;  %vm1607_vm14 = vcmp.eq.f32.partialorder %v1606_v50, 8.507059e+37 }
 0x258   : > { %1043 = vst [vmem:[%s2629_s21 + $0x300] sm:$0xff] %v589_v32 }
 0x259   : > { %v2210_v31 = vpop.eup %2209  ;;  %v1586_v33 = vadd.f32 %v2208_v12, %v1585_v46  ;;  %v2026_v35 = vmul.f32 -1.442695, %v952_v30 }
 0x25a   : > { %v2212_v54 = vpop.eup %2211  ;;  %v3322_v19 = vadd.f32 1.0, %v2210_v31 }
 0x25b   : > { %v1590_v42 = vsel %vm1589_vm9, %v2208_v12, %v1586_v33  ;;  %v1598_v43 = vmul.f32 %v2212_v54, %v3306_v38  ;;  %2213 = vpow2.f32 %v2026_v35  ;;  %v814_v48 = vpop.f32.mrf.mxu3  ;;  %vm1603_vm11 = vweird.f32 %v2212_v54 }
 0x25c   : > { %v1595_v39 = vsel %vm1592_vm10, %v1594_v37, %v1590_v42  ;;  %2215 = vrcp.f32 %v3322_v19  ;;  %v725_v49 = vpop.f32.mrf.mxu2  ;;  %v815_v63 = vadd.f32 %v814_v48, %v2920_v18  ;;  %vm1604_vm13 = vmor %vm1602_vm12, %vm1603_vm11  ;;  %v1623_v61 = vand.u32 2147483648, %v3322_v19 }
 0x25d   : > { %1726 = vst.msk [vmem:[%s2629_s21 + $0x3e0] sm:$0xff] %vm304_vm0, %v1595_v39  ;;  %v1599_v40 = vsub.f32 1.0, %v1598_v43  ;;  %v726_v14 = vadd.f32 %v725_v49, %v2741_v62  ;;  %v591_v0 = vpop.f32.mrf.mxu1  ;;  %v1621_v20 = vand.u32 2147483647, %v3322_v19  ;;  %vm1617_vm1 = vweird.f32 %v3322_v19 }
 0x25e   : > { %v592_v55 = vadd.f32 %v591_v0, %v2895_v59  ;;  %v954_v51 = vpop.f32.mrf.mxu0  ;;  %1045 = vst [vmem:[%s2629_s21 + $0x310] sm:$0xff] %v815_v63  ;;  %v1624_v22 = vor.u32 1.1754944e-38, %v1623_v61 }
 0x25f   : > { %v1600_v3 = vmul.f32 %v2212_v54, %v1599_v40  ;;  %1076 = vst [vmem:[%s2629_s21 + $0x448] sm:$0xff] %v726_v14  ;;  %v955_v34 = vadd.f32 %v954_v51, %v2725_v36  ;;  %vm1622_vm3 = vcmp.eq.f32.partialorder %v1621_v20, 8.507059e+37 }
 0x260   : > { %1047 = vst [vmem:[%s2629_s21 + $0x328] sm:$0xff] %v592_v55 }
 0x261   : > { %v2214_v1 = vpop.eup %2213  ;;  %v1601_v41 = vadd.f32 %v2212_v54, %v1600_v3  ;;  %v2027_v4 = vmul.f32 -1.442695, %v955_v34 }
 0x262   : > { %v2216_v56 = vpop.eup %2215  ;;  %v3338_v6 = vadd.f32 1.0, %v2214_v1 }
 0x263   : > { %v1605_v7 = vsel %vm1604_vm13, %v2212_v54, %v1601_v41  ;;  %v1613_v8 = vmul.f32 %v2216_v56, %v3322_v19  ;;  %2217 = vpow2.f32 %v2027_v4  ;;  %v817_v9 = vpop.f32.mrf.mxu3  ;;  %vm1618_vm15 = vweird.f32 %v2216_v56 }
 0x264   : > { %v1610_v28 = vsel %vm1607_vm14, %v1609_v5, %v1605_v7  ;;  %2219 = vrcp.f32 %v3338_v6  ;;  %v728_v10 = vpop.f32.mrf.mxu2  ;;  %v818_v44 = vadd.f32 %v817_v9, %v2920_v18  ;;  %vm1619_vm2 = vmor %vm1617_vm1, %vm1618_vm15  ;;  %v1638_v46 = vand.u32 2147483648, %v3338_v6 }
 0x265   : > { %1727 = vst.msk [vmem:[%s2629_s21 + $0x408] sm:$0xff] %vm304_vm0, %v1610_v28  ;;  %v1614_v11 = vsub.f32 1.0, %v1613_v8  ;;  %v729_v13 = vadd.f32 %v728_v10, %v2741_v62  ;;  %v594_v45 = vpop.f32.mrf.mxu1  ;;  %v1636_v33 = vand.u32 2147483647, %v3338_v6  ;;  %vm1632_vm5 = vweird.f32 %v3338_v6 }
 0x266   : > { %v595_v15 = vadd.f32 %v594_v45, %v2895_v59  ;;  %v957_v17 = vpop.f32.mrf.mxu0  ;;  %1049 = vst [vmem:[%s2629_s21 + $0x338] sm:$0xff] %v818_v44  ;;  %v1639_v43 = vor.u32 1.1754944e-38, %v1638_v46 }
 0x267   : > { %v1615_v16 = vmul.f32 %v2216_v56, %v1614_v11  ;;  %1080 = vst [vmem:[%s2629_s21 + $0x470] sm:$0xff] %v729_v13  ;;  %v958_v52 = vadd.f32 %v957_v17, %v2725_v36  ;;  %vm1637_vm7 = vcmp.eq.f32.partialorder %v1636_v33, 8.507059e+37 }
 0x268   : > { %1051 = vst [vmem:[%s2629_s21 + $0x350] sm:$0xff] %v595_v15 }
 0x269   : > { %v2218_v12 = vpop.eup %2217  ;;  %v1616_v21 = vadd.f32 %v2216_v56, %v1615_v16  ;;  %v2028_v38 = vmul.f32 -1.442695, %v958_v52 }
 0x26a   : > { %v2220_v58 = vpop.eup %2219  ;;  %v3354_v53 = vadd.f32 1.0, %v2218_v12 }
 0x26b   : > { %v1620_v57 = vsel %vm1619_vm2, %v2216_v56, %v1616_v21  ;;  %v1628_v25 = vmul.f32 %v2220_v58, %v3338_v6  ;;  %2221 = vpow2.f32 %v2028_v38  ;;  %v820_v24 = vpop.f32.mrf.mxu3  ;;  %vm1633_vm4 = vweird.f32 %v2220_v58 }
 0x26c   : > { %v1625_v60 = vsel %vm1622_vm3, %v1624_v22, %v1620_v57  ;;  %2223 = vrcp.f32 %v3354_v53  ;;  %v731_v23 = vpop.f32.mrf.mxu2  ;;  %v821_v32 = vadd.f32 %v820_v24, %v2920_v18  ;;  %vm1634_vm6 = vmor %vm1632_vm5, %vm1633_vm4  ;;  %v1653_v3 = vand.u32 2147483648, %v3354_v53 }
 0x26d   : > { %1728 = vst.msk [vmem:[%s2629_s21 + $0x430] sm:$0xff] %vm304_vm0, %v1625_v60  ;;  %v1629_v47 = vsub.f32 1.0, %v1628_v25  ;;  %v732_v26 = vadd.f32 %v731_v23, %v2741_v62  ;;  %v597_v27 = vpop.f32.mrf.mxu1  ;;  %v1651_v41 = vand.u32 2147483647, %v3354_v53  ;;  %vm1647_vm9 = vweird.f32 %v3354_v53 }
 0x26e   : > { %v598_v29 = vadd.f32 %v597_v27, %v2895_v59  ;;  %v960_v30 = vpop.f32.mrf.mxu0  ;;  %1053 = vst [vmem:[%s2629_s21 + $0x360] sm:$0xff] %v821_v32  ;;  %v1654_v8 = vor.u32 1.1754944e-38, %v1653_v3 }
 0x26f   : > { %v1630_v31 = vmul.f32 %v2220_v58, %v1629_v47  ;;  %1084 = vst [vmem:[%s2629_s21 + $0x498] sm:$0xff] %v732_v26  ;;  %v961_v35 = vadd.f32 %v960_v30, %v2725_v36  ;;  %vm1652_vm11 = vcmp.eq.f32.partialorder %v1651_v41, 8.507059e+37 }
 0x270   : > { %1055 = vst [vmem:[%s2629_s21 + $0x378] sm:$0xff] %v598_v29 }
 0x271   : > { %v2222_v54 = vpop.eup %2221  ;;  %v1631_v37 = vadd.f32 %v2220_v58, %v1630_v31  ;;  %v2029_v19 = vmul.f32 -1.442695, %v961_v35 }
 0x272   : > { %v2224_v42 = vpop.eup %2223  ;;  %v1219_v48 = vadd.f32 1.0, %v2222_v54 }
 0x273   : > { %v1635_v39 = vsel %vm1634_vm6, %v2220_v58, %v1631_v37  ;;  %v1643_v49 = vmul.f32 %v2224_v42, %v3354_v53  ;;  %2225 = vpow2.f32 %v2029_v19  ;;  %v823_v40 = vpop.f32.mrf.mxu3  ;;  %vm1648_vm8 = vweird.f32 %v2224_v42 }
 0x274   : > { %v1640_v14 = vsel %vm1637_vm7, %v1639_v43, %v1635_v39  ;;  %2227 = vrcp.f32 %v1219_v48  ;;  %v734_v63 = vpop.f32.mrf.mxu2  ;;  %v824_v55 = vadd.f32 %v823_v40, %v2920_v18  ;;  %vm1649_vm10 = vmor %vm1647_vm9, %vm1648_vm8  ;;  %v1668_v17 = vand.u32 2147483648, %v1219_v48 }
 0x275   : > { %1729 = vst.msk [vmem:[%s2629_s21 + $0x458] sm:$0xff] %vm304_vm0, %v1640_v14  ;;  %v1644_v0 = vsub.f32 1.0, %v1643_v49  ;;  %v735_v2 = vadd.f32 %v734_v63, %v2741_v62  ;;  %v600_v51 = vpop.f32.mrf.mxu1  ;;  %v1666_v52 = vand.u32 2147483647, %v1219_v48  ;;  %vm1662_vm13 = vweird.f32 %v1219_v48 }
 0x276   : > { %v601_v50 = vadd.f32 %v600_v51, %v2895_v59  ;;  %v963_v34 = vpop.f32.mrf.mxu0  ;;  %1057 = vst [vmem:[%s2629_s21 + $0x388] sm:$0xff] %v824_v55  ;;  %v1669_v58 = vor.u32 1.1754944e-38, %v1668_v17 }
 0x277   : > { %v1645_v1 = vmul.f32 %v2224_v42, %v1644_v0  ;;  %1088 = vst [vmem:[%s2629_s21 + $0x4c0] sm:$0xff] %v735_v2  ;;  %v964_v4 = vadd.f32 %v963_v34, %v2725_v36  ;;  %vm1667_vm15 = vcmp.eq.f32.partialorder %v1666_v52, 8.507059e+37 }
 0x278   : > { %1059 = vst [vmem:[%s2629_s21 + $0x3a0] sm:$0xff] %v601_v50 }
 0x279   : > { %v2226_v56 = vpop.eup %2225  ;;  %v1646_v5 = vadd.f32 %v2224_v42, %v1645_v1  ;;  %v2030_v6 = vmul.f32 -1.442695, %v964_v4 }
 0x27a   : > { %v2228_v7 = vpop.eup %2227  ;;  %v1220_v9 = vadd.f32 1.0, %v2226_v56 }
 0x27b   : > { %v1650_v28 = vsel %vm1649_vm10, %v2224_v42, %v1646_v5  ;;  %v1658_v10 = vmul.f32 %v2228_v7, %v1219_v48  ;;  %2229 = vpow2.f32 %v2030_v6  ;;  %v826_v11 = vpop.f32.mrf.mxu3  ;;  %vm1663_vm12 = vweird.f32 %v2228_v7 }
 0x27c   : > { %v1655_v36 = vsel %vm1652_vm11, %v1654_v8, %v1650_v28  ;;  %2231 = vrcp.f32 %v1220_v9  ;;  %v737_v13 = vpop.f32.mrf.mxu2  ;;  %v827_v61 = vadd.f32 %v826_v11, %v2920_v18  ;;  %vm1664_vm14 = vmor %vm1662_vm13, %vm1663_vm12  ;;  %v1683_v47 = vand.u32 2147483648, %v1220_v9 }
 0x27d   : > { %1730 = vst.msk [vmem:[%s2629_s21 + $0x480] sm:$0xff] %vm304_vm0, %v1655_v36  ;;  %v1659_v44 = vsub.f32 1.0, %v1658_v10  ;;  %v738_v45 = vadd.f32 %v737_v13, %v2741_v62  ;;  %v603_v15 = vpop.f32.mrf.mxu1  ;;  %v1681_v27 = vand.u32 2147483647, %v1220_v9  ;;  %vm1677_vm2 = vweird.f32 %v1220_v9 }
 0x27e   : > { %v604_v16 = vadd.f32 %v603_v15, %v2895_v59  ;;  %1061 = vst [vmem:[%s2629_s21 + $0x3b0] sm:$0xff] %v827_v61  ;;  %v1684_v30 = vor.u32 1.1754944e-38, %v1683_v47 }
 0x27f   : > { %v1660_v20 = vmul.f32 %v2228_v7, %v1659_v44  ;;  %1092 = vst [vmem:[%s2629_s21 + $0x4e8] sm:$0xff] %v738_v45  ;;  %vm1682_vm4 = vcmp.eq.f32.partialorder %v1681_v27, 8.507059e+37 }
 0x280   : > { %1063 = vst [vmem:[%s2629_s21 + $0x3c8] sm:$0xff] %v604_v16 }
 0x281   : > { %v2230_v12 = vpop.eup %2229  ;;  %v1661_v21 = vadd.f32 %v2228_v7, %v1660_v20 }
 0x282   : > { %v2232_v38 = vpop.eup %2231  ;;  %v1221_v62 = vadd.f32 1.0, %v2230_v12 }
 0x283   : > { %v1665_v22 = vsel %vm1664_vm14, %v2228_v7, %v1661_v21  ;;  %v1673_v53 = vmul.f32 %v2232_v38, %v1220_v9  ;;  %v829_v57 = vpop.f32.mrf.mxu3  ;;  %vm1678_vm1 = vweird.f32 %v2232_v38 }
 0x284   : > { %v1670_v25 = vsel %vm1667_vm15, %v1669_v58, %v1665_v22  ;;  %2233 = vrcp.f32 %v1221_v62  ;;  %v830_v60 = vadd.f32 %v829_v57, %v2920_v18  ;;  %vm1679_vm3 = vmor %vm1677_vm2, %vm1678_vm1  ;;  %v1698_v43 = vand.u32 2147483648, %v1221_v62 }
 0x285   : > { %1731 = vst.msk [vmem:[%s2629_s21 + $0x4a8] sm:$0xff] %vm304_vm0, %v1670_v25  ;;  %v1674_v24 = vsub.f32 1.0, %v1673_v53  ;;  %v606_v23 = vpop.f32.mrf.mxu1  ;;  %v1696_v49 = vand.u32 2147483647, %v1221_v62  ;;  %vm1692_vm6 = vweird.f32 %v1221_v62 }
 0x286   : > { %v607_v26 = vadd.f32 %v606_v23, %v2895_v59  ;;  %1065 = vst [vmem:[%s2629_s21 + $0x3d8] sm:$0xff] %v830_v60  ;;  %v1699_v14 = vor.u32 1.1754944e-38, %v1698_v43 }
 0x287   : > { %v1675_v32 = vmul.f32 %v2232_v38, %v1674_v24  ;;  %vm1697_vm8 = vcmp.eq.f32.partialorder %v1696_v49, 8.507059e+37 }
 0x288   : > { %1067 = vst [vmem:[%s2629_s21 + $0x3f0] sm:$0xff] %v607_v26 }
 0x289   : > { %v1676_v46 = vadd.f32 %v2232_v38, %v1675_v32 }
 0x28a   : > { %v2234_v29 = vpop.eup %2233 }
 0x28b   : > { %v1680_v31 = vsel %vm1679_vm3, %v2232_v38, %v1676_v46  ;;  %v1688_v33 = vmul.f32 %v2234_v29, %v1221_v62  ;;  %v832_v35 = vpop.f32.mrf.mxu3  ;;  %vm1693_vm5 = vweird.f32 %v2234_v29 }
 0x28c   : > { %v1685_v54 = vsel %vm1682_vm4, %v1684_v30, %v1680_v31  ;;  %v833_v37 = vadd.f32 %v832_v35, %v2920_v18  ;;  %vm1694_vm7 = vmor %vm1692_vm6, %vm1693_vm5 }
 0x28d   : > { %1732 = vst.msk [vmem:[%s2629_s21 + $0x4d0] sm:$0xff] %vm304_vm0, %v1685_v54  ;;  %v1689_v19 = vsub.f32 1.0, %v1688_v33  ;;  %v609_v42 = vpop.f32.mrf.mxu1 }
 0x28e   : > { %1069 = vst [vmem:[%s2629_s21 + $0x400] sm:$0xff] %v833_v37  ;;  %v610_v48 = vadd.f32 %v609_v42, %v2895_v59 }
 0x28f   : > { %v1690_v39 = vmul.f32 %v2234_v29, %v1689_v19 }
 0x290   : > { %1071 = vst [vmem:[%s2629_s21 + $0x418] sm:$0xff] %v610_v48 }
 0x291   : > { %v1691_v40 = vadd.f32 %v2234_v29, %v1690_v39 }
 0x293   : > { %v1695_v63 = vsel %vm1694_vm7, %v2234_v29, %v1691_v40  ;;  %v835_v0 = vpop.f32.mrf.mxu3 }
 0x294   : > { %v1700_v2 = vsel %vm1697_vm8, %v1699_v14, %v1695_v63  ;;  %v836_v55 = vadd.f32 %v835_v0, %v2920_v18 }
 0x295   : > { %1733 = vst.msk [vmem:[%s2629_s21 + $0x4f8] sm:$0xff] %vm304_vm0, %v1700_v2  ;;  %v612_v51 = vpop.f32.mrf.mxu1 }
 0x296   : > { %1073 = vst [vmem:[%s2629_s21 + $0x428] sm:$0xff] %v836_v55  ;;  %v613_v3 = vadd.f32 %v612_v51, %v2895_v59 }
 0x298   : > { %1075 = vst [vmem:[%s2629_s21 + $0x440] sm:$0xff] %v613_v3 }
 0x29b   : > { %v838_v50 = vpop.f32.mrf.mxu3 }
 0x29c   : > { %v839_v34 = vadd.f32 %v838_v50, %v2920_v18 }
 0x29d   : > { %v615_v1 = vpop.f32.mrf.mxu1 }
 0x29e   : > { %1077 = vst [vmem:[%s2629_s21 + $0x450] sm:$0xff] %v839_v34  ;;  %v616_v41 = vadd.f32 %v615_v1, %v2895_v59 }
 0x2a0   : > { %1079 = vst [vmem:[%s2629_s21 + $0x468] sm:$0xff] %v616_v41 }
 0x2a3   : > { %v841_v4 = vpop.f32.mrf.mxu3 }
 0x2a4   : > { %v842_v56 = vadd.f32 %v841_v4, %v2920_v18 }
 0x2a5   : > { %v618_v5 = vpop.f32.mrf.mxu1 }
 0x2a6   : > { %1081 = vst [vmem:[%s2629_s21 + $0x478] sm:$0xff] %v842_v56  ;;  %v619_v6 = vadd.f32 %v618_v5, %v2895_v59 }
 0x2a8   : > { %1083 = vst [vmem:[%s2629_s21 + $0x490] sm:$0xff] %v619_v6 }
 0x2ab   : > { %v844_v7 = vpop.f32.mrf.mxu3 }
 0x2ac   : > { %v845_v8 = vadd.f32 %v844_v7, %v2920_v18 }
 0x2ad   : > { %v621_v9 = vpop.f32.mrf.mxu1 }
 0x2ae   : > { %1085 = vst [vmem:[%s2629_s21 + $0x4a0] sm:$0xff] %v845_v8  ;;  %v622_v28 = vadd.f32 %v621_v9, %v2895_v59 }
 0x2b0   : > { %1087 = vst [vmem:[%s2629_s21 + $0x4b8] sm:$0xff] %v622_v28 }
 0x2b3   : > { %v847_v10 = vpop.f32.mrf.mxu3 }
 0x2b4   : > { %v848_v11 = vadd.f32 %v847_v10, %v2920_v18 }
 0x2b5   : > { %v624_v36 = vpop.f32.mrf.mxu1 }
 0x2b6   : > { %1089 = vst [vmem:[%s2629_s21 + $0x4c8] sm:$0xff] %v848_v11  ;;  %v625_v13 = vadd.f32 %v624_v36, %v2895_v59 }
 0x2b8   : > { %1091 = vst [vmem:[%s2629_s21 + $0x4e0] sm:$0xff] %v625_v13 }
 0x2bb   : > { %v850_v44 = vpop.f32.mrf.mxu3 }
 0x2bc   : > { %v851_v45 = vadd.f32 %v850_v44, %v2920_v18 }
 0x2be   : > { %1093 = vst [vmem:[%s2629_s21 + $0x4f0] sm:$0xff] %v851_v45 }
 0x2bf   : > { %2262 = shalt.err (!%p2259_p5)
}
 0x2c0   : > { %s2315_s10 = smov 640   ;;  %s2316_s18 = smov 40  }
 0x2c1   : > { %2049 = dma.vmem_to_hbm [thread:$0]  (%p2377_p4), %s1751_s29, 20480, %s1753_s30, %s1735_s15, %s2315_s10, %s2315_s10, %s2316_s18  }
 0x2c2 PF: > { %p2055_p6 = scmp.ge.s32.totalorder %s2313_s17, 2  ;;  %s1767_s19 = sand.u32 1, %s2293_s12  }
 0x2c3   : > { %s1768_s21 = scalar_lea.sflag [#allocation3], %s1767_s19 }
 0x2c4   : > { %p2052_p7 = pnand %p2055_p6, %p2384_p8 }
 0x2c6   : > { %p2053_p9 = pneg %p2052_p7 }
 0x2c8   : > { %2288 = dma.done.wait (%p2053_p9), %s1768_s21, 20480  }
 0x2c9   : > { %2290 = vsyncadd (%p2053_p9), %s1768_s21, 4294946816  ;;  %s16_s17 = sadd.s32 1, %s2313_s17   ;;  %s3472_s12 = smov %s2297_s13 }
 0x2ca   : > { %p13_p10 = scmp.ge.s32.totalorder %s16_s17, 4   ;;  %s3473_s13 = smov %s2301_s14 }
 0x2cb   : > { %s3474_s14 = smov %s2390_s25  ;;  %s3475_s15 = smov %s2309_s16 }
 0x2cc   : > { %s3476_s16 = smov %s3478_s20  ;;  %15 = sbr.rel (!%p13_p10) target bundleno = 4 (0x4), region = 67 }
 0x2d1   :  { %1774 = vsyncpa [#allocation3], 1 }
 0x2d2   :  { %1776 = vsyncpa [#allocation3 + $0x1], 1 }

</bundles_post_ra>
